<compile_context>
chip_gen: v5e
topology: v5e:2x2
jax: 0.10.0
libtpu: 0.0.40
codegen_flags: <defaults>
</compile_context>

<pallas_src>
import jax
import jax.numpy as jnp
from jax import lax
from jax.experimental import pallas as pl
from jax.experimental.pallas import tpu as pltpu

# --- configuration (matches BinConv constraints; small but grid-exercising) ---
B = 32       # batch
L = 16       # context_length
N = 32       # num_bins
F = 8        # num_filters_2d == num_filters_1d
NB = 3       # num_blocks
K2D = 3      # kernel_size_across_bins_2d (odd)
K1D = 3      # kernel_size_across_bins_1d (odd)
KFFN = 7     # kernel_size_ffn (odd)
REP = L // F # out-channels per group in the grouped Conv1d (L % F == 0)
BN = B * N   # packed lane width of the whole batch

TILE = 256           # lanes per grid step (multiple of 128 and of N)
GRID = BN // TILE    # batch-tile grid
P2D, P1D, PFFN = K2D // 2, K1D // 2, KFFN // 2
MAXSH = max(P2D, P1D, PFFN)

# --- packed weight-slab layout (row offsets are multiples of 8) ---
R_W2D = 0                       # (F, K2D*L)
R_W1B = R_W2D + 8               # (L, K1D*F)
R_W1A = R_W1B + L               # (F, K1D) + per-F-channel vectors in columns
R_B1B = R_W1A + 8               # (L, 1)
ROWS_PER_BLK = R_B1B + L        # 48 rows / block
R_HEAD = NB * ROWS_PER_BLK      # (L, KFFN) + bffn scalar
SLAB_ROWS = R_HEAD + L          # 160 rows total
C_W1A, C_B2D, C_DYTW, C_DYTB, C_B1A, C_DYTA = 0, K1D, K1D + 1, K1D + 2, K1D + 3, K1D + 4

assert BN % TILE == 0 and TILE % N == 0 and TILE % 128 == 0
assert F == 8 and L % 8 == 0 and L % F == 0
assert K2D % 2 == 1 and K1D % 2 == 1 and KFFN % 2 == 1
assert K2D * L <= 128 and K1D * F <= 128 and KFFN + 1 <= 128


def binconv_kernel(x_ref, w_ref, out_ref):
    x = x_ref[...]                                    # (L, TILE) f32, batch packed on lanes

    # --- in-kernel colmod (lane index within its bin segment) + hoisted pad masks ---
    lane = lax.broadcasted_iota(jnp.int32, (1, TILE), 1)
    colmod = lane & (N - 1) if (N & (N - 1)) == 0 else lane % N
    right_pad = {s: colmod >= (N - s) for s in range(1, MAXSH + 1)}   # -> 0.0
    left_pad = {s: colmod < s for s in range(1, MAXSH + 1)}           # -> 1.0

    def shift(t, s):
        """w[:, b*N+n] == padded_segment_b(t)[:, n+s]; left pad 1.0, right pad 0.0."""
        if s == 0:
            return t
        y = pltpu.roll(t, (-s) % TILE, axis=1)        # XLU lane rotate == jnp.roll(t, -s, 1)
        if s > 0:
            return jnp.where(right_pad[s], 0.0, y)
        return jnp.where(left_pad[-s], 1.0, y)

    for blk in range(NB):
        r = blk * ROWS_PER_BLK
        w2d = w_ref[r + R_W2D:r + R_W2D + F, 0:K2D * L]                  # (F, K2D*L)
        w1b = w_ref[r + R_W1B:r + R_W1B + L, 0:K1D * F]                  # (L, K1D*F)
        w1a = w_ref[r + R_W1A:r + R_W1A + F, C_W1A:C_W1A + K1D]          # (F, K1D)
        b2d = w_ref[r + R_W1A:r + R_W1A + F, C_B2D:C_B2D + 1]            # (F, 1)
        dyt_w = w_ref[r + R_W1A:r + R_W1A + F, C_DYTW:C_DYTW + 1]
        dyt_b = w_ref[r + R_W1A:r + R_W1A + F, C_DYTB:C_DYTB + 1]
        b1a = w_ref[r + R_W1A:r + R_W1A + F, C_B1A:C_B1A + 1]
        dyt_a = w_ref[r + R_W1A:r + R_W1A + 1, C_DYTA:C_DYTA + 1]        # (1, 1)
        b1b = w_ref[r + R_B1B:r + R_B1B + L, 0:1]                        # (L, 1)

        residual = x

        # ---- Conv2d(1 -> F, kernel (L, K2D)): ONE im2col MXU matmul ----
        xim = jnp.concatenate([shift(x, dk - P2D) for dk in range(K2D)], axis=0)
        h = jnp.dot(w2d, xim, preferred_element_type=jnp.float32) + b2d   # (F, TILE)

        # ---- DynamicTanh over the F channel axis (channels_last=False) ----
        h = jnp.tanh(dyt_a * h) * dyt_w + dyt_b

        # ---- Conv1d #0: depthwise F -> F (groups=F) + ReLU (VPU MACs) ----
        acc1 = w1a[:, 0:1] * shift(h, -P1D)
        for dk in range(1, K1D):
            acc1 = acc1 + w1a[:, dk:dk + 1] * shift(h, dk - P1D)
        acc1 = jnp.maximum(acc1 + b1a, 0.0)                               # (F, TILE)

        # ---- Conv1d #1: grouped F -> L (groups=F) + ReLU; group replication
        #      folded into w1b -> ONE im2col MXU matmul ----
        him = jnp.concatenate([shift(acc1, dk - P1D) for dk in range(K1D)], axis=0)
        acc2 = jnp.dot(w1b, him, preferred_element_type=jnp.float32)
        acc2 = jnp.maximum(acc2 + b1b, 0.0)                               # (L, TILE)

        # nn.Dropout is identity at inference time
        x = acc2 + residual

    # ---- conv_ffn: Conv1d(L -> 1, KFFN) as VPU MACs + one cross-sublane reduce ----
    wffn = w_ref[R_HEAD:R_HEAD + L, 0:KFFN]                               # (L, KFFN)
    bffn = w_ref[R_HEAD:R_HEAD + 1, KFFN:KFFN + 1]                        # (1, 1)
    acc = wffn[:, 0:1] * shift(x, -PFFN)
    for dk in range(1, KFFN):
        acc = acc + wffn[:, dk:dk + 1] * shift(x, dk - PFFN)
    out_ref[...] = jnp.sum(acc, axis=0, keepdims=True) + bffn


@jax.jit
def binconv_forward(x, wslab):
    # Pack the batch along the lane axis: (B, L, N) -> (L, B*N).
    xp = jnp.transpose(x, (1, 0, 2)).reshape(L, BN)
    out = pl.pallas_call(
        binconv_kernel,
        out_shape=jax.ShapeDtypeStruct((1, BN), jnp.float32),
        grid_spec=pltpu.PrefetchScalarGridSpec(
            num_scalar_prefetch=0,
            grid=(GRID,),                                   # batch-tile grid, pipelined
            in_specs=[
                pl.BlockSpec((L, TILE), lambda i: (0, i)),          # x tile per step
                pl.BlockSpec((SLAB_ROWS, 128), lambda i: (0, 0)),   # weights VMEM-resident
            ],
            out_specs=pl.BlockSpec((1, TILE), lambda i: (0, i)),    # lane-dense output
        ),
        compiler_params=pltpu.CompilerParams(
            dimension_semantics=("parallel",)),             # halo-free batch split (v7x 2 TCs)
    )(xp, wslab)
    return out.reshape(B, N)                                # (B, num_bins)


def init_params(key):
    """Deterministic synthetic parameters in PyTorch layout + the packed kernel slab."""
    ks = jax.random.split(key, 10)
    s = 0.1
    # PyTorch-layout parameters (used by the independent reference)
    w2d_t = s * jax.random.normal(ks[0], (NB, F, 1, L, K2D), jnp.float32)   # Conv2d OIHW
    b2d = s * jax.random.normal(ks[1], (NB, F), jnp.float32)
    w1a_t = s * jax.random.normal(ks[2], (NB, F, 1, K1D), jnp.float32)      # Conv1d OIW
    b1a = s * jax.random.normal(ks[3], (NB, F), jnp.float32)
    w1b_t = s * jax.random.normal(ks[4], (NB, L, 1, K1D), jnp.float32)      # Conv1d OIW
    b1b = s * jax.random.normal(ks[5], (NB, L), jnp.float32)
    wffn_t = s * jax.random.normal(ks[6], (1, L, KFFN), jnp.float32)        # Conv1d OIW
    bffn = s * jax.random.normal(ks[7], (1,), jnp.float32)
    dyt_a = jnp.full((NB,), 0.5, jnp.float32)                               # DyT alpha
    dyt_w = 1.0 + s * jax.random.normal(ks[8], (NB, F), jnp.float32)
    dyt_b = s * jax.random.normal(ks[9], (NB, F), jnp.float32)

    torch_p = dict(w2d_t=w2d_t, b2d=b2d, w1a_t=w1a_t, b1a=b1a, w1b_t=w1b_t,
                   b1b=b1b, wffn_t=wffn_t, bffn=bffn, dyt_a=dyt_a,
                   dyt_w=dyt_w, dyt_b=dyt_b)

    # ---- pack everything into ONE lane-dense (SLAB_ROWS, 128) f32 slab ----
    group_onehot = (jnp.arange(L)[:, None] // REP == jnp.arange(F)[None, :]
                    ).astype(jnp.float32)                                   # (L, F)
    slab = jnp.zeros((SLAB_ROWS, 128), jnp.float32)
    for blk in range(NB):
        r = blk * ROWS_PER_BLK
        # w2d[f, dk*L + l] = w2d_t[blk, f, 0, l, dk]
        w2d = jnp.transpose(w2d_t[blk, :, 0], (0, 2, 1)).reshape(F, K2D * L)
        slab = slab.at[r + R_W2D:r + R_W2D + F, 0:K2D * L].set(w2d)
        # w1b[l, dk*F + f] = w1b_t[blk, l, 0, dk] * [f == l // REP]
        w1b = (w1b_t[blk, :, 0, :, None] * group_onehot[:, None, :]).reshape(L, K1D * F)
        slab = slab.at[r + R_W1B:r + R_W1B + L, 0:K1D * F].set(w1b)
        slab = slab.at[r + R_W1A:r + R_W1A + F, C_W1A:C_W1A + K1D].set(w1a_t[blk, :, 0, :])
        slab = slab.at[r + R_W1A:r + R_W1A + F, C_B2D].set(b2d[blk])
        slab = slab.at[r + R_W1A:r + R_W1A + F, C_DYTW].set(dyt_w[blk])
        slab = slab.at[r + R_W1A:r + R_W1A + F, C_DYTB].set(dyt_b[blk])
        slab = slab.at[r + R_W1A:r + R_W1A + F, C_B1A].set(b1a[blk])
        slab = slab.at[r + R_W1A, C_DYTA].set(dyt_a[blk])
        slab = slab.at[r + R_B1B:r + R_B1B + L, 0].set(b1b[blk])
    slab = slab.at[R_HEAD:R_HEAD + L, 0:KFFN].set(wffn_t[0])
    slab = slab.at[R_HEAD, KFFN].set(bffn[0])
    return torch_p, slab


def reference_forward(x, p):
    """Pure-JAX reference mirroring the PyTorch forward (lax.conv, HIGHEST precision)."""
    hp = lax.Precision.HIGHEST

    def pad_bins(t, pad):
        if pad == 0:
            return t
        left = jnp.full(t.shape[:-1] + (pad,), 1.0, t.dtype)
        right = jnp.zeros(t.shape[:-1] + (pad,), t.dtype)
        return jnp.concatenate([left, t, right], axis=-1)

    h = x
    for blk in range(NB):
        residual = h
        xp = pad_bins(h, K2D // 2)[:, None, :, :]              # (B,1,L,Np)
        y = lax.conv_general_dilated(
            xp, p['w2d_t'][blk], (1, 1), 'VALID',
            dimension_numbers=('NCHW', 'OIHW', 'NCHW'), precision=hp)
        y = y[:, :, 0, :] + p['b2d'][blk][None, :, None]       # (B,F,N)
        y = (jnp.tanh(p['dyt_a'][blk] * y) * p['dyt_w'][blk][None, :, None]
             + p['dyt_b'][blk][None, :, None])

        yp = pad_bins(y, K1D // 2)
        y = lax.conv_general_dilated(
            yp, p['w1a_t'][blk], (1,), 'VALID',
            dimension_numbers=('NCH', 'OIH', 'NCH'), feature_group_count=F,
            precision=hp)
        y = jnp.maximum(y + p['b1a'][blk][None, :, None], 0.0)

        yp = pad_bins(y, K1D // 2)
        y = lax.conv_general_dilated(
            yp, p['w1b_t'][blk], (1,), 'VALID',
            dimension_numbers=('NCH', 'OIH', 'NCH'), feature_group_count=F,
            precision=hp)
        y = jnp.maximum(y + p['b1b'][blk][None, :, None], 0.0)

        h = y + residual                                       # dropout == id

    xp = pad_bins(h, KFFN // 2)
    y = lax.conv_general_dilated(
        xp, p['wffn_t'], (1,), 'VALID',
        dimension_numbers=('NCH', 'OIH', 'NCH'), precision=hp)
    return y[:, 0, :] + p['bffn'][0]                           # (B, N)


if __name__ == "__main__":
    key = jax.random.PRNGKey(0)
    kx, kp = jax.random.split(key)
    # binary-quantized style input, as produced by BinaryQuantizer
    x = jax.random.bernoulli(kx, 0.5, (B, L, N)).astype(jnp.float32)
    torch_p, wslab = init_params(kp)

    out = jax.block_until_ready(binconv_forward(x, wslab))
    assert out.shape == (B, N), out.shape

    ref = jax.block_until_ready(reference_forward(x, torch_p))
    err = float(jnp.max(jnp.abs(out - ref)))
    assert err < 1e-4, f"max abs err vs reference: {err}"

    # TODO(synk): forecast() (autoregressive sampling + scaler/quantizer pipeline) is
    # host-side control flow; for production it should be folded in as an extra
    # "arbitrary" grid axis with the weight slab resident and the evolving context
    # carried via input_output_aliases rather than re-launching per step.
    print("KERNEL_OK")
</pallas_src>

<mosaic_0001>
module attributes {stable_mosaic.version = 11 : i64} {
  func.func @binconv_kernel(%arg0: i32, %arg1: memref<16x256xf32, #tpu.memory_space<vmem>>, %arg2: memref<160x128xf32, #tpu.memory_space<vmem>>, %arg3: memref<1x256xf32, #tpu.memory_space<vmem>>) attributes {dimension_semantics = [#tpu.dimension_semantics<parallel>], iteration_bounds = array<i64: 4>, scalar_prefetch = 0 : i64, scratch_operands = 0 : i64, tpu.core_type = #tpu.core_type<tc>, window_params = [{transform_indices = @transform_0, window_bounds = array<i64: 16, 256>}, {pipeline_mode = #tpu.pipeline_mode<synchronous>, transform_indices = @transform_1, window_bounds = array<i64: 160, 128>}, {transform_indices = @transform_2, window_bounds = array<i64: 1, 256>}]} {
    %c0 = arith.constant 0 : index
    %c0_0 = arith.constant 0 : index
    %0 = vector.load %arg1[%c0, %c0_0] : memref<16x256xf32, #tpu.memory_space<vmem>>, vector<16x256xf32>
    %1 = tpu.iota {dimensions = array<i32: 1>} : vector<1x256xi32>
    %c31_i32 = arith.constant 31 : i32
    %2 = vector.broadcast %c31_i32 : i32 to vector<1x256xi32>
    %3 = arith.andi %1, %2 : vector<1x256xi32>
    %c31_i32_1 = arith.constant 31 : i32
    %4 = vector.broadcast %c31_i32_1 : i32 to vector<1x256xi32>
    %5 = arith.cmpi sge, %3, %4 : vector<1x256xi32>
    %c30_i32 = arith.constant 30 : i32
    %6 = vector.broadcast %c30_i32 : i32 to vector<1x256xi32>
    %7 = arith.cmpi sge, %3, %6 : vector<1x256xi32>
    %c29_i32 = arith.constant 29 : i32
    %8 = vector.broadcast %c29_i32 : i32 to vector<1x256xi32>
    %9 = arith.cmpi sge, %3, %8 : vector<1x256xi32>
    %c1_i32 = arith.constant 1 : i32
    %10 = vector.broadcast %c1_i32 : i32 to vector<1x256xi32>
    %11 = arith.cmpi slt, %3, %10 : vector<1x256xi32>
    %c2_i32 = arith.constant 2 : i32
    %12 = vector.broadcast %c2_i32 : i32 to vector<1x256xi32>
    %13 = arith.cmpi slt, %3, %12 : vector<1x256xi32>
    %c3_i32 = arith.constant 3 : i32
    %14 = vector.broadcast %c3_i32 : i32 to vector<1x256xi32>
    %15 = arith.cmpi slt, %3, %14 : vector<1x256xi32>
    %c0_2 = arith.constant 0 : index
    %c0_3 = arith.constant 0 : index
    %16 = vector.load %arg2[%c0_2, %c0_3] : memref<160x128xf32, #tpu.memory_space<vmem>>, vector<8x48xf32>
    %c8 = arith.constant 8 : index
    %c0_4 = arith.constant 0 : index
    %17 = vector.load %arg2[%c8, %c0_4] : memref<160x128xf32, #tpu.memory_space<vmem>>, vector<16x24xf32>
    %c24 = arith.constant 24 : index
    %c0_5 = arith.constant 0 : index
    %18 = vector.load %arg2[%c24, %c0_5] : memref<160x128xf32, #tpu.memory_space<vmem>>, vector<8x3xf32>
    %c24_6 = arith.constant 24 : index
    %c3 = arith.constant 3 : index
    %19 = vector.load %arg2[%c24_6, %c3] : memref<160x128xf32, #tpu.memory_space<vmem>>, vector<8x1xf32>
    %c24_7 = arith.constant 24 : index
    %c4 = arith.constant 4 : index
    %20 = vector.load %arg2[%c24_7, %c4] : memref<160x128xf32, #tpu.memory_space<vmem>>, vector<8x1xf32>
    %c24_8 = arith.constant 24 : index
    %c5 = arith.constant 5 : index
    %21 = vector.load %arg2[%c24_8, %c5] : memref<160x128xf32, #tpu.memory_space<vmem>>, vector<8x1xf32>
    %c24_9 = arith.constant 24 : index
    %c6 = arith.constant 6 : index
    %22 = vector.load %arg2[%c24_9, %c6] : memref<160x128xf32, #tpu.memory_space<vmem>>, vector<8x1xf32>
    %c24_10 = arith.constant 24 : index
    %c7 = arith.constant 7 : index
    %23 = vector.load %arg2[%c24_10, %c7] : memref<160x128xf32, #tpu.memory_space<vmem>>, vector<1x1xf32>
    %c32 = arith.constant 32 : index
    %c0_11 = arith.constant 0 : index
    %24 = vector.load %arg2[%c32, %c0_11] : memref<160x128xf32, #tpu.memory_space<vmem>>, vector<16x1xf32>
    %c1_i32_12 = arith.constant 1 : i32
    %25 = tpu.dynamic_rotate %0 by %c1_i32_12 dim 1 : vector<16x256xf32>, i32 -> vector<16x256xf32>
    %cst = arith.constant 1.000000e+00 : f32
    %26 = vector.shape_cast %11 : vector<1x256xi1> to vector<1x256xi1>
    %27 = vector.broadcast %26 : vector<1x256xi1> to vector<16x256xi1>
    %28 = vector.broadcast %cst : f32 to vector<16x256xf32>
    %29 = arith.select %27, %28, %25 : vector<16x256xi1>, vector<16x256xf32>
    %c255_i32 = arith.constant 255 : i32
    %30 = tpu.dynamic_rotate %0 by %c255_i32 dim 1 : vector<16x256xf32>, i32 -> vector<16x256xf32>
    %cst_13 = arith.constant 0.000000e+00 : f32
    %31 = vector.shape_cast %5 : vector<1x256xi1> to vector<1x256xi1>
    %32 = vector.broadcast %31 : vector<1x256xi1> to vector<16x256xi1>
    %33 = vector.broadcast %cst_13 : f32 to vector<16x256xf32>
    %34 = arith.select %32, %33, %30 : vector<16x256xi1>, vector<16x256xf32>
    %35 = tpu.concatenate %29, %0, %34 in 0 : vector<16x256xf32>, vector<16x256xf32>, vector<16x256xf32> -> vector<48x256xf32>
    %cst_14 = arith.constant dense<0.000000e+00> : vector<8x256xf32>
    %36 = tpu.matmul %16, %35, %cst_14 {dimension_numbers = #tpu.dot_dimension_numbers<[1], [0], [0], [1], [0, 0, 1, 1], [], []>} : vector<8x48xf32>, vector<48x256xf32>, vector<8x256xf32> -> vector<8x256xf32>
    %37 = vector.broadcast %19 : vector<8x1xf32> to vector<8x256xf32>
    %38 = arith.addf %36, %37 : vector<8x256xf32>
    %39 = vector.broadcast %23 : vector<1x1xf32> to vector<8x256xf32>
    %40 = arith.mulf %39, %38 : vector<8x256xf32>
    %41 = math.tanh %40 : vector<8x256xf32>
    %42 = vector.broadcast %20 : vector<8x1xf32> to vector<8x256xf32>
    %43 = arith.mulf %41, %42 : vector<8x256xf32>
    %44 = vector.broadcast %21 : vector<8x1xf32> to vector<8x256xf32>
    %45 = arith.addf %43, %44 : vector<8x256xf32>
    %46 = vector.extract_strided_slice %18 {offsets = [0, 0], sizes = [8, 1], strides = [1, 1]} : vector<8x3xf32> to vector<8x1xf32>
    %c1_i32_15 = arith.constant 1 : i32
    %47 = tpu.dynamic_rotate %45 by %c1_i32_15 dim 1 : vector<8x256xf32>, i32 -> vector<8x256xf32>
    %cst_16 = arith.constant 1.000000e+00 : f32
    %48 = vector.shape_cast %11 : vector<1x256xi1> to vector<1x256xi1>
    %49 = vector.broadcast %48 : vector<1x256xi1> to vector<8x256xi1>
    %50 = vector.broadcast %cst_16 : f32 to vector<8x256xf32>
    %51 = arith.select %49, %50, %47 : vector<8x256xi1>, vector<8x256xf32>
    %52 = vector.broadcast %46 : vector<8x1xf32> to vector<8x256xf32>
    %53 = arith.mulf %52, %51 : vector<8x256xf32>
    %54 = vector.extract_strided_slice %18 {offsets = [0, 1], sizes = [8, 1], strides = [1, 1]} : vector<8x3xf32> to vector<8x1xf32>
    %55 = vector.broadcast %54 : vector<8x1xf32> to vector<8x256xf32>
    %56 = arith.mulf %55, %45 : vector<8x256xf32>
    %57 = arith.addf %53, %56 : vector<8x256xf32>
    %58 = vector.extract_strided_slice %18 {offsets = [0, 2], sizes = [8, 1], strides = [1, 1]} : vector<8x3xf32> to vector<8x1xf32>
    %c255_i32_17 = arith.constant 255 : i32
    %59 = tpu.dynamic_rotate %45 by %c255_i32_17 dim 1 : vector<8x256xf32>, i32 -> vector<8x256xf32>
    %cst_18 = arith.constant 0.000000e+00 : f32
    %60 = vector.shape_cast %5 : vector<1x256xi1> to vector<1x256xi1>
    %61 = vector.broadcast %60 : vector<1x256xi1> to vector<8x256xi1>
    %62 = vector.broadcast %cst_18 : f32 to vector<8x256xf32>
    %63 = arith.select %61, %62, %59 : vector<8x256xi1>, vector<8x256xf32>
    %64 = vector.broadcast %58 : vector<8x1xf32> to vector<8x256xf32>
    %65 = arith.mulf %64, %63 : vector<8x256xf32>
    %66 = arith.addf %57, %65 : vector<8x256xf32>
    %67 = vector.broadcast %22 : vector<8x1xf32> to vector<8x256xf32>
    %68 = arith.addf %66, %67 : vector<8x256xf32>
    %cst_19 = arith.constant 0.000000e+00 : f32
    %69 = vector.broadcast %cst_19 : f32 to vector<8x256xf32>
    %70 = arith.maximumf %68, %69 : vector<8x256xf32>
    %c1_i32_20 = arith.constant 1 : i32
    %71 = tpu.dynamic_rotate %70 by %c1_i32_20 dim 1 : vector<8x256xf32>, i32 -> vector<8x256xf32>
    %cst_21 = arith.constant 1.000000e+00 : f32
    %72 = vector.shape_cast %11 : vector<1x256xi1> to vector<1x256xi1>
    %73 = vector.broadcast %72 : vector<1x256xi1> to vector<8x256xi1>
    %74 = vector.broadcast %cst_21 : f32 to vector<8x256xf32>
    %75 = arith.select %73, %74, %71 : vector<8x256xi1>, vector<8x256xf32>
    %c255_i32_22 = arith.constant 255 : i32
    %76 = tpu.dynamic_rotate %70 by %c255_i32_22 dim 1 : vector<8x256xf32>, i32 -> vector<8x256xf32>
    %cst_23 = arith.constant 0.000000e+00 : f32
    %77 = vector.shape_cast %5 : vector<1x256xi1> to vector<1x256xi1>
    %78 = vector.broadcast %77 : vector<1x256xi1> to vector<8x256xi1>
    %79 = vector.broadcast %cst_23 : f32 to vector<8x256xf32>
    %80 = arith.select %78, %79, %76 : vector<8x256xi1>, vector<8x256xf32>
    %81 = tpu.concatenate %75, %70, %80 in 0 : vector<8x256xf32>, vector<8x256xf32>, vector<8x256xf32> -> vector<24x256xf32>
    %cst_24 = arith.constant dense<0.000000e+00> : vector<16x256xf32>
    %82 = tpu.matmul %17, %81, %cst_24 {dimension_numbers = #tpu.dot_dimension_numbers<[1], [0], [0], [1], [0, 0, 1, 1], [], []>} : vector<16x24xf32>, vector<24x256xf32>, vector<16x256xf32> -> vector<16x256xf32>
    %83 = vector.broadcast %24 : vector<16x1xf32> to vector<16x256xf32>
    %84 = arith.addf %82, %83 : vector<16x256xf32>
    %cst_25 = arith.constant 0.000000e+00 : f32
    %85 = vector.broadcast %cst_25 : f32 to vector<16x256xf32>
    %86 = arith.maximumf %84, %85 : vector<16x256xf32>
    %87 = arith.addf %86, %0 : vector<16x256xf32>
    %c48 = arith.constant 48 : index
    %c0_26 = arith.constant 0 : index
    %88 = vector.load %arg2[%c48, %c0_26] : memref<160x128xf32, #tpu.memory_space<vmem>>, vector<8x48xf32>
    %c56 = arith.constant 56 : index
    %c0_27 = arith.constant 0 : index
    %89 = vector.load %arg2[%c56, %c0_27] : memref<160x128xf32, #tpu.memory_space<vmem>>, vector<16x24xf32>
    %c72 = arith.constant 72 : index
    %c0_28 = arith.constant 0 : index
    %90 = vector.load %arg2[%c72, %c0_28] : memref<160x128xf32, #tpu.memory_space<vmem>>, vector<8x3xf32>
    %c72_29 = arith.constant 72 : index
    %c3_30 = arith.constant 3 : index
    %91 = vector.load %arg2[%c72_29, %c3_30] : memref<160x128xf32, #tpu.memory_space<vmem>>, vector<8x1xf32>
    %c72_31 = arith.constant 72 : index
    %c4_32 = arith.constant 4 : index
    %92 = vector.load %arg2[%c72_31, %c4_32] : memref<160x128xf32, #tpu.memory_space<vmem>>, vector<8x1xf32>
    %c72_33 = arith.constant 72 : index
    %c5_34 = arith.constant 5 : index
    %93 = vector.load %arg2[%c72_33, %c5_34] : memref<160x128xf32, #tpu.memory_space<vmem>>, vector<8x1xf32>
    %c72_35 = arith.constant 72 : index
    %c6_36 = arith.constant 6 : index
    %94 = vector.load %arg2[%c72_35, %c6_36] : memref<160x128xf32, #tpu.memory_space<vmem>>, vector<8x1xf32>
    %c72_37 = arith.constant 72 : index
    %c7_38 = arith.constant 7 : index
    %95 = vector.load %arg2[%c72_37, %c7_38] : memref<160x128xf32, #tpu.memory_space<vmem>>, vector<1x1xf32>
    %c80 = arith.constant 80 : index
    %c0_39 = arith.constant 0 : index
    %96 = vector.load %arg2[%c80, %c0_39] : memref<160x128xf32, #tpu.memory_space<vmem>>, vector<16x1xf32>
    %c1_i32_40 = arith.constant 1 : i32
    %97 = tpu.dynamic_rotate %87 by %c1_i32_40 dim 1 : vector<16x256xf32>, i32 -> vector<16x256xf32>
    %cst_41 = arith.constant 1.000000e+00 : f32
    %98 = vector.shape_cast %11 : vector<1x256xi1> to vector<1x256xi1>
    %99 = vector.broadcast %98 : vector<1x256xi1> to vector<16x256xi1>
    %100 = vector.broadcast %cst_41 : f32 to vector<16x256xf32>
    %101 = arith.select %99, %100, %97 : vector<16x256xi1>, vector<16x256xf32>
    %c255_i32_42 = arith.constant 255 : i32
    %102 = tpu.dynamic_rotate %87 by %c255_i32_42 dim 1 : vector<16x256xf32>, i32 -> vector<16x256xf32>
    %cst_43 = arith.constant 0.000000e+00 : f32
    %103 = vector.shape_cast %5 : vector<1x256xi1> to vector<1x256xi1>
    %104 = vector.broadcast %103 : vector<1x256xi1> to vector<16x256xi1>
    %105 = vector.broadcast %cst_43 : f32 to vector<16x256xf32>
    %106 = arith.select %104, %105, %102 : vector<16x256xi1>, vector<16x256xf32>
    %107 = tpu.concatenate %101, %87, %106 in 0 : vector<16x256xf32>, vector<16x256xf32>, vector<16x256xf32> -> vector<48x256xf32>
    %cst_44 = arith.constant dense<0.000000e+00> : vector<8x256xf32>
    %108 = tpu.matmul %88, %107, %cst_44 {dimension_numbers = #tpu.dot_dimension_numbers<[1], [0], [0], [1], [0, 0, 1, 1], [], []>} : vector<8x48xf32>, vector<48x256xf32>, vector<8x256xf32> -> vector<8x256xf32>
    %109 = vector.broadcast %91 : vector<8x1xf32> to vector<8x256xf32>
    %110 = arith.addf %108, %109 : vector<8x256xf32>
    %111 = vector.broadcast %95 : vector<1x1xf32> to vector<8x256xf32>
    %112 = arith.mulf %111, %110 : vector<8x256xf32>
    %113 = math.tanh %112 : vector<8x256xf32>
    %114 = vector.broadcast %92 : vector<8x1xf32> to vector<8x256xf32>
    %115 = arith.mulf %113, %114 : vector<8x256xf32>
    %116 = vector.broadcast %93 : vector<8x1xf32> to vector<8x256xf32>
    %117 = arith.addf %115, %116 : vector<8x256xf32>
    %118 = vector.extract_strided_slice %90 {offsets = [0, 0], sizes = [8, 1], strides = [1, 1]} : vector<8x3xf32> to vector<8x1xf32>
    %c1_i32_45 = arith.constant 1 : i32
    %119 = tpu.dynamic_rotate %117 by %c1_i32_45 dim 1 : vector<8x256xf32>, i32 -> vector<8x256xf32>
    %cst_46 = arith.constant 1.000000e+00 : f32
    %120 = vector.shape_cast %11 : vector<1x256xi1> to vector<1x256xi1>
    %121 = vector.broadcast %120 : vector<1x256xi1> to vector<8x256xi1>
    %122 = vector.broadcast %cst_46 : f32 to vector<8x256xf32>
    %123 = arith.select %121, %122, %119 : vector<8x256xi1>, vector<8x256xf32>
    %124 = vector.broadcast %118 : vector<8x1xf32> to vector<8x256xf32>
    %125 = arith.mulf %124, %123 : vector<8x256xf32>
    %126 = vector.extract_strided_slice %90 {offsets = [0, 1], sizes = [8, 1], strides = [1, 1]} : vector<8x3xf32> to vector<8x1xf32>
    %127 = vector.broadcast %126 : vector<8x1xf32> to vector<8x256xf32>
    %128 = arith.mulf %127, %117 : vector<8x256xf32>
    %129 = arith.addf %125, %128 : vector<8x256xf32>
    %130 = vector.extract_strided_slice %90 {offsets = [0, 2], sizes = [8, 1], strides = [1, 1]} : vector<8x3xf32> to vector<8x1xf32>
    %c255_i32_47 = arith.constant 255 : i32
    %131 = tpu.dynamic_rotate %117 by %c255_i32_47 dim 1 : vector<8x256xf32>, i32 -> vector<8x256xf32>
    %cst_48 = arith.constant 0.000000e+00 : f32
    %132 = vector.shape_cast %5 : vector<1x256xi1> to vector<1x256xi1>
    %133 = vector.broadcast %132 : vector<1x256xi1> to vector<8x256xi1>
    %134 = vector.broadcast %cst_48 : f32 to vector<8x256xf32>
    %135 = arith.select %133, %134, %131 : vector<8x256xi1>, vector<8x256xf32>
    %136 = vector.broadcast %130 : vector<8x1xf32> to vector<8x256xf32>
    %137 = arith.mulf %136, %135 : vector<8x256xf32>
    %138 = arith.addf %129, %137 : vector<8x256xf32>
    %139 = vector.broadcast %94 : vector<8x1xf32> to vector<8x256xf32>
    %140 = arith.addf %138, %139 : vector<8x256xf32>
    %cst_49 = arith.constant 0.000000e+00 : f32
    %141 = vector.broadcast %cst_49 : f32 to vector<8x256xf32>
    %142 = arith.maximumf %140, %141 : vector<8x256xf32>
    %c1_i32_50 = arith.constant 1 : i32
    %143 = tpu.dynamic_rotate %142 by %c1_i32_50 dim 1 : vector<8x256xf32>, i32 -> vector<8x256xf32>
    %cst_51 = arith.constant 1.000000e+00 : f32
    %144 = vector.shape_cast %11 : vector<1x256xi1> to vector<1x256xi1>
    %145 = vector.broadcast %144 : vector<1x256xi1> to vector<8x256xi1>
    %146 = vector.broadcast %cst_51 : f32 to vector<8x256xf32>
    %147 = arith.select %145, %146, %143 : vector<8x256xi1>, vector<8x256xf32>
    %c255_i32_52 = arith.constant 255 : i32
    %148 = tpu.dynamic_rotate %142 by %c255_i32_52 dim 1 : vector<8x256xf32>, i32 -> vector<8x256xf32>
    %cst_53 = arith.constant 0.000000e+00 : f32
    %149 = vector.shape_cast %5 : vector<1x256xi1> to vector<1x256xi1>
    %150 = vector.broadcast %149 : vector<1x256xi1> to vector<8x256xi1>
    %151 = vector.broadcast %cst_53 : f32 to vector<8x256xf32>
    %152 = arith.select %150, %151, %148 : vector<8x256xi1>, vector<8x256xf32>
    %153 = tpu.concatenate %147, %142, %152 in 0 : vector<8x256xf32>, vector<8x256xf32>, vector<8x256xf32> -> vector<24x256xf32>
    %cst_54 = arith.constant dense<0.000000e+00> : vector<16x256xf32>
    %154 = tpu.matmul %89, %153, %cst_54 {dimension_numbers = #tpu.dot_dimension_numbers<[1], [0], [0], [1], [0, 0, 1, 1], [], []>} : vector<16x24xf32>, vector<24x256xf32>, vector<16x256xf32> -> vector<16x256xf32>
    %155 = vector.broadcast %96 : vector<16x1xf32> to vector<16x256xf32>
    %156 = arith.addf %154, %155 : vector<16x256xf32>
    %cst_55 = arith.constant 0.000000e+00 : f32
    %157 = vector.broadcast %cst_55 : f32 to vector<16x256xf32>
    %158 = arith.maximumf %156, %157 : vector<16x256xf32>
    %159 = arith.addf %158, %87 : vector<16x256xf32>
    %c96 = arith.constant 96 : index
    %c0_56 = arith.constant 0 : index
    %160 = vector.load %arg2[%c96, %c0_56] : memref<160x128xf32, #tpu.memory_space<vmem>>, vector<8x48xf32>
    %c104 = arith.constant 104 : index
    %c0_57 = arith.constant 0 : index
    %161 = vector.load %arg2[%c104, %c0_57] : memref<160x128xf32, #tpu.memory_space<vmem>>, vector<16x24xf32>
    %c120 = arith.constant 120 : index
    %c0_58 = arith.constant 0 : index
    %162 = vector.load %arg2[%c120, %c0_58] : memref<160x128xf32, #tpu.memory_space<vmem>>, vector<8x3xf32>
    %c120_59 = arith.constant 120 : index
    %c3_60 = arith.constant 3 : index
    %163 = vector.load %arg2[%c120_59, %c3_60] : memref<160x128xf32, #tpu.memory_space<vmem>>, vector<8x1xf32>
    %c120_61 = arith.constant 120 : index
    %c4_62 = arith.constant 4 : index
    %164 = vector.load %arg2[%c120_61, %c4_62] : memref<160x128xf32, #tpu.memory_space<vmem>>, vector<8x1xf32>
    %c120_63 = arith.constant 120 : index
    %c5_64 = arith.constant 5 : index
    %165 = vector.load %arg2[%c120_63, %c5_64] : memref<160x128xf32, #tpu.memory_space<vmem>>, vector<8x1xf32>
    %c120_65 = arith.constant 120 : index
    %c6_66 = arith.constant 6 : index
    %166 = vector.load %arg2[%c120_65, %c6_66] : memref<160x128xf32, #tpu.memory_space<vmem>>, vector<8x1xf32>
    %c120_67 = arith.constant 120 : index
    %c7_68 = arith.constant 7 : index
    %167 = vector.load %arg2[%c120_67, %c7_68] : memref<160x128xf32, #tpu.memory_space<vmem>>, vector<1x1xf32>
    %c128 = arith.constant 128 : index
    %c0_69 = arith.constant 0 : index
    %168 = vector.load %arg2[%c128, %c0_69] : memref<160x128xf32, #tpu.memory_space<vmem>>, vector<16x1xf32>
    %c1_i32_70 = arith.constant 1 : i32
    %169 = tpu.dynamic_rotate %159 by %c1_i32_70 dim 1 : vector<16x256xf32>, i32 -> vector<16x256xf32>
    %cst_71 = arith.constant 1.000000e+00 : f32
    %170 = vector.shape_cast %11 : vector<1x256xi1> to vector<1x256xi1>
    %171 = vector.broadcast %170 : vector<1x256xi1> to vector<16x256xi1>
    %172 = vector.broadcast %cst_71 : f32 to vector<16x256xf32>
    %173 = arith.select %171, %172, %169 : vector<16x256xi1>, vector<16x256xf32>
    %c255_i32_72 = arith.constant 255 : i32
    %174 = tpu.dynamic_rotate %159 by %c255_i32_72 dim 1 : vector<16x256xf32>, i32 -> vector<16x256xf32>
    %cst_73 = arith.constant 0.000000e+00 : f32
    %175 = vector.shape_cast %5 : vector<1x256xi1> to vector<1x256xi1>
    %176 = vector.broadcast %175 : vector<1x256xi1> to vector<16x256xi1>
    %177 = vector.broadcast %cst_73 : f32 to vector<16x256xf32>
    %178 = arith.select %176, %177, %174 : vector<16x256xi1>, vector<16x256xf32>
    %179 = tpu.concatenate %173, %159, %178 in 0 : vector<16x256xf32>, vector<16x256xf32>, vector<16x256xf32> -> vector<48x256xf32>
    %cst_74 = arith.constant dense<0.000000e+00> : vector<8x256xf32>
    %180 = tpu.matmul %160, %179, %cst_74 {dimension_numbers = #tpu.dot_dimension_numbers<[1], [0], [0], [1], [0, 0, 1, 1], [], []>} : vector<8x48xf32>, vector<48x256xf32>, vector<8x256xf32> -> vector<8x256xf32>
    %181 = vector.broadcast %163 : vector<8x1xf32> to vector<8x256xf32>
    %182 = arith.addf %180, %181 : vector<8x256xf32>
    %183 = vector.broadcast %167 : vector<1x1xf32> to vector<8x256xf32>
    %184 = arith.mulf %183, %182 : vector<8x256xf32>
    %185 = math.tanh %184 : vector<8x256xf32>
    %186 = vector.broadcast %164 : vector<8x1xf32> to vector<8x256xf32>
    %187 = arith.mulf %185, %186 : vector<8x256xf32>
    %188 = vector.broadcast %165 : vector<8x1xf32> to vector<8x256xf32>
    %189 = arith.addf %187, %188 : vector<8x256xf32>
    %190 = vector.extract_strided_slice %162 {offsets = [0, 0], sizes = [8, 1], strides = [1, 1]} : vector<8x3xf32> to vector<8x1xf32>
    %c1_i32_75 = arith.constant 1 : i32
    %191 = tpu.dynamic_rotate %189 by %c1_i32_75 dim 1 : vector<8x256xf32>, i32 -> vector<8x256xf32>
    %cst_76 = arith.constant 1.000000e+00 : f32
    %192 = vector.shape_cast %11 : vector<1x256xi1> to vector<1x256xi1>
    %193 = vector.broadcast %192 : vector<1x256xi1> to vector<8x256xi1>
    %194 = vector.broadcast %cst_76 : f32 to vector<8x256xf32>
    %195 = arith.select %193, %194, %191 : vector<8x256xi1>, vector<8x256xf32>
    %196 = vector.broadcast %190 : vector<8x1xf32> to vector<8x256xf32>
    %197 = arith.mulf %196, %195 : vector<8x256xf32>
    %198 = vector.extract_strided_slice %162 {offsets = [0, 1], sizes = [8, 1], strides = [1, 1]} : vector<8x3xf32> to vector<8x1xf32>
    %199 = vector.broadcast %198 : vector<8x1xf32> to vector<8x256xf32>
    %200 = arith.mulf %199, %189 : vector<8x256xf32>
    %201 = arith.addf %197, %200 : vector<8x256xf32>
    %202 = vector.extract_strided_slice %162 {offsets = [0, 2], sizes = [8, 1], strides = [1, 1]} : vector<8x3xf32> to vector<8x1xf32>
    %c255_i32_77 = arith.constant 255 : i32
    %203 = tpu.dynamic_rotate %189 by %c255_i32_77 dim 1 : vector<8x256xf32>, i32 -> vector<8x256xf32>
    %cst_78 = arith.constant 0.000000e+00 : f32
    %204 = vector.shape_cast %5 : vector<1x256xi1> to vector<1x256xi1>
    %205 = vector.broadcast %204 : vector<1x256xi1> to vector<8x256xi1>
    %206 = vector.broadcast %cst_78 : f32 to vector<8x256xf32>
    %207 = arith.select %205, %206, %203 : vector<8x256xi1>, vector<8x256xf32>
    %208 = vector.broadcast %202 : vector<8x1xf32> to vector<8x256xf32>
    %209 = arith.mulf %208, %207 : vector<8x256xf32>
    %210 = arith.addf %201, %209 : vector<8x256xf32>
    %211 = vector.broadcast %166 : vector<8x1xf32> to vector<8x256xf32>
    %212 = arith.addf %210, %211 : vector<8x256xf32>
    %cst_79 = arith.constant 0.000000e+00 : f32
    %213 = vector.broadcast %cst_79 : f32 to vector<8x256xf32>
    %214 = arith.maximumf %212, %213 : vector<8x256xf32>
    %c1_i32_80 = arith.constant 1 : i32
    %215 = tpu.dynamic_rotate %214 by %c1_i32_80 dim 1 : vector<8x256xf32>, i32 -> vector<8x256xf32>
    %cst_81 = arith.constant 1.000000e+00 : f32
    %216 = vector.shape_cast %11 : vector<1x256xi1> to vector<1x256xi1>
    %217 = vector.broadcast %216 : vector<1x256xi1> to vector<8x256xi1>
    %218 = vector.broadcast %cst_81 : f32 to vector<8x256xf32>
    %219 = arith.select %217, %218, %215 : vector<8x256xi1>, vector<8x256xf32>
    %c255_i32_82 = arith.constant 255 : i32
    %220 = tpu.dynamic_rotate %214 by %c255_i32_82 dim 1 : vector<8x256xf32>, i32 -> vector<8x256xf32>
    %cst_83 = arith.constant 0.000000e+00 : f32
    %221 = vector.shape_cast %5 : vector<1x256xi1> to vector<1x256xi1>
    %222 = vector.broadcast %221 : vector<1x256xi1> to vector<8x256xi1>
    %223 = vector.broadcast %cst_83 : f32 to vector<8x256xf32>
    %224 = arith.select %222, %223, %220 : vector<8x256xi1>, vector<8x256xf32>
    %225 = tpu.concatenate %219, %214, %224 in 0 : vector<8x256xf32>, vector<8x256xf32>, vector<8x256xf32> -> vector<24x256xf32>
    %cst_84 = arith.constant dense<0.000000e+00> : vector<16x256xf32>
    %226 = tpu.matmul %161, %225, %cst_84 {dimension_numbers = #tpu.dot_dimension_numbers<[1], [0], [0], [1], [0, 0, 1, 1], [], []>} : vector<16x24xf32>, vector<24x256xf32>, vector<16x256xf32> -> vector<16x256xf32>
    %227 = vector.broadcast %168 : vector<16x1xf32> to vector<16x256xf32>
    %228 = arith.addf %226, %227 : vector<16x256xf32>
    %cst_85 = arith.constant 0.000000e+00 : f32
    %229 = vector.broadcast %cst_85 : f32 to vector<16x256xf32>
    %230 = arith.maximumf %228, %229 : vector<16x256xf32>
    %231 = arith.addf %230, %159 : vector<16x256xf32>
    %c144 = arith.constant 144 : index
    %c0_86 = arith.constant 0 : index
    %232 = vector.load %arg2[%c144, %c0_86] : memref<160x128xf32, #tpu.memory_space<vmem>>, vector<16x7xf32>
    %c144_87 = arith.constant 144 : index
    %c7_88 = arith.constant 7 : index
    %233 = vector.load %arg2[%c144_87, %c7_88] : memref<160x128xf32, #tpu.memory_space<vmem>>, vector<1x1xf32>
    %234 = vector.extract_strided_slice %232 {offsets = [0, 0], sizes = [16, 1], strides = [1, 1]} : vector<16x7xf32> to vector<16x1xf32>
    %c3_i32_89 = arith.constant 3 : i32
    %235 = tpu.dynamic_rotate %231 by %c3_i32_89 dim 1 : vector<16x256xf32>, i32 -> vector<16x256xf32>
    %cst_90 = arith.constant 1.000000e+00 : f32
    %236 = vector.shape_cast %15 : vector<1x256xi1> to vector<1x256xi1>
    %237 = vector.broadcast %236 : vector<1x256xi1> to vector<16x256xi1>
    %238 = vector.broadcast %cst_90 : f32 to vector<16x256xf32>
    %239 = arith.select %237, %238, %235 : vector<16x256xi1>, vector<16x256xf32>
    %240 = vector.broadcast %234 : vector<16x1xf32> to vector<16x256xf32>
    %241 = arith.mulf %240, %239 : vector<16x256xf32>
    %242 = vector.extract_strided_slice %232 {offsets = [0, 1], sizes = [16, 1], strides = [1, 1]} : vector<16x7xf32> to vector<16x1xf32>
    %c2_i32_91 = arith.constant 2 : i32
    %243 = tpu.dynamic_rotate %231 by %c2_i32_91 dim 1 : vector<16x256xf32>, i32 -> vector<16x256xf32>
    %cst_92 = arith.constant 1.000000e+00 : f32
    %244 = vector.shape_cast %13 : vector<1x256xi1> to vector<1x256xi1>
    %245 = vector.broadcast %244 : vector<1x256xi1> to vector<16x256xi1>
    %246 = vector.broadcast %cst_92 : f32 to vector<16x256xf32>
    %247 = arith.select %245, %246, %243 : vector<16x256xi1>, vector<16x256xf32>
    %248 = vector.broadcast %242 : vector<16x1xf32> to vector<16x256xf32>
    %249 = arith.mulf %248, %247 : vector<16x256xf32>
    %250 = arith.addf %241, %249 : vector<16x256xf32>
    %251 = vector.extract_strided_slice %232 {offsets = [0, 2], sizes = [16, 1], strides = [1, 1]} : vector<16x7xf32> to vector<16x1xf32>
    %c1_i32_93 = arith.constant 1 : i32
    %252 = tpu.dynamic_rotate %231 by %c1_i32_93 dim 1 : vector<16x256xf32>, i32 -> vector<16x256xf32>
    %cst_94 = arith.constant 1.000000e+00 : f32
    %253 = vector.shape_cast %11 : vector<1x256xi1> to vector<1x256xi1>
    %254 = vector.broadcast %253 : vector<1x256xi1> to vector<16x256xi1>
    %255 = vector.broadcast %cst_94 : f32 to vector<16x256xf32>
    %256 = arith.select %254, %255, %252 : vector<16x256xi1>, vector<16x256xf32>
    %257 = vector.broadcast %251 : vector<16x1xf32> to vector<16x256xf32>
    %258 = arith.mulf %257, %256 : vector<16x256xf32>
    %259 = arith.addf %250, %258 : vector<16x256xf32>
    %260 = vector.extract_strided_slice %232 {offsets = [0, 3], sizes = [16, 1], strides = [1, 1]} : vector<16x7xf32> to vector<16x1xf32>
    %261 = vector.broadcast %260 : vector<16x1xf32> to vector<16x256xf32>
    %262 = arith.mulf %261, %231 : vector<16x256xf32>
    %263 = arith.addf %259, %262 : vector<16x256xf32>
    %264 = vector.extract_strided_slice %232 {offsets = [0, 4], sizes = [16, 1], strides = [1, 1]} : vector<16x7xf32> to vector<16x1xf32>
    %c255_i32_95 = arith.constant 255 : i32
    %265 = tpu.dynamic_rotate %231 by %c255_i32_95 dim 1 : vector<16x256xf32>, i32 -> vector<16x256xf32>
    %cst_96 = arith.constant 0.000000e+00 : f32
    %266 = vector.shape_cast %5 : vector<1x256xi1> to vector<1x256xi1>
    %267 = vector.broadcast %266 : vector<1x256xi1> to vector<16x256xi1>
    %268 = vector.broadcast %cst_96 : f32 to vector<16x256xf32>
    %269 = arith.select %267, %268, %265 : vector<16x256xi1>, vector<16x256xf32>
    %270 = vector.broadcast %264 : vector<16x1xf32> to vector<16x256xf32>
    %271 = arith.mulf %270, %269 : vector<16x256xf32>
    %272 = arith.addf %263, %271 : vector<16x256xf32>
    %273 = vector.extract_strided_slice %232 {offsets = [0, 5], sizes = [16, 1], strides = [1, 1]} : vector<16x7xf32> to vector<16x1xf32>
    %c254_i32 = arith.constant 254 : i32
    %274 = tpu.dynamic_rotate %231 by %c254_i32 dim 1 : vector<16x256xf32>, i32 -> vector<16x256xf32>
    %cst_97 = arith.constant 0.000000e+00 : f32
    %275 = vector.shape_cast %7 : vector<1x256xi1> to vector<1x256xi1>
    %276 = vector.broadcast %275 : vector<1x256xi1> to vector<16x256xi1>
    %277 = vector.broadcast %cst_97 : f32 to vector<16x256xf32>
    %278 = arith.select %276, %277, %274 : vector<16x256xi1>, vector<16x256xf32>
    %279 = vector.broadcast %273 : vector<16x1xf32> to vector<16x256xf32>
    %280 = arith.mulf %279, %278 : vector<16x256xf32>
    %281 = arith.addf %272, %280 : vector<16x256xf32>
    %282 = vector.extract_strided_slice %232 {offsets = [0, 6], sizes = [16, 1], strides = [1, 1]} : vector<16x7xf32> to vector<16x1xf32>
    %c253_i32 = arith.constant 253 : i32
    %283 = tpu.dynamic_rotate %231 by %c253_i32 dim 1 : vector<16x256xf32>, i32 -> vector<16x256xf32>
    %cst_98 = arith.constant 0.000000e+00 : f32
    %284 = vector.shape_cast %9 : vector<1x256xi1> to vector<1x256xi1>
    %285 = vector.broadcast %284 : vector<1x256xi1> to vector<16x256xi1>
    %286 = vector.broadcast %cst_98 : f32 to vector<16x256xf32>
    %287 = arith.select %285, %286, %283 : vector<16x256xi1>, vector<16x256xf32>
    %288 = vector.broadcast %282 : vector<16x1xf32> to vector<16x256xf32>
    %289 = arith.mulf %288, %287 : vector<16x256xf32>
    %290 = arith.addf %281, %289 : vector<16x256xf32>
    %cst_99 = arith.constant dense<0.000000e+00> : vector<256xf32>
    %291 = vector.multi_reduction <add>, %290, %cst_99 [0] : vector<16x256xf32> to vector<256xf32>
    %292 = vector.shape_cast %291 : vector<256xf32> to vector<1x256xf32>
    %293 = vector.broadcast %233 : vector<1x1xf32> to vector<1x256xf32>
    %294 = arith.addf %292, %293 : vector<1x256xf32>
    %c0_100 = arith.constant 0 : index
    %c0_101 = arith.constant 0 : index
    %295 = vector.load %arg3[%c0_100, %c0_101] : memref<1x256xf32, #tpu.memory_space<vmem>>, vector<1x256xf32>
    tpu.vector_store %arg3[%c0_100, %c0_101], %294 {strides = array<i32>} : memref<1x256xf32, #tpu.memory_space<vmem>>, vector<1x256xf32>,
    return
  }
  func.func @transform_0(%arg0: i32) -> (i32, i32) {
    %c0_i32 = arith.constant 0 : i32
    %c0_i32_0 = arith.constant 0 : i32
    return %c0_i32, %arg0 : i32, i32
  }
  func.func @transform_1(%arg0: i32) -> (i32, i32) {
    %c0_i32 = arith.constant 0 : i32
    %c0_i32_0 = arith.constant 0 : i32
    %c0_i32_1 = arith.constant 0 : i32
    return %c0_i32, %c0_i32_0 : i32, i32
  }
  func.func @transform_2(%arg0: i32) -> (i32, i32) {
    %c0_i32 = arith.constant 0 : i32
    %c0_i32_0 = arith.constant 0 : i32
    return %c0_i32, %arg0 : i32, i32
  }
}

</mosaic_0001>

<bundles_post_ra>
// kernel: binconv_forward.1
= control target key start
LH: loop header
LB: loop body
LE: loop exit
PB: predicated region body
PF: predicated region fallthrough
CT: control target
= control target key end

     0   :  { %s1513_s9 = smov 0   ;;  %s1515_s10 = smov 0   ;;  %s2276_s0 = inlined_call_operand.vmem [shape: f32[16,1024], index: 0, kind: input, shape index: {}]   ;;  %s2277_s1 = inlined_call_operand.vmem [shape: f32[160,128], index: 1, kind: input, shape index: {}]   ;;  %s2278_s2 = inlined_call_operand.vmem [shape: f32[1,1024], index: 2, kind: output, shape index: {}]  }
   0x1   :  { %s1517_s11 = smov 0  }
   0x2 LB: > { %s1243_s12 = sadd.s32 4294967295, %s1481_s11   ;;  %s1530_s13 = sadd.s32 1, %s1481_s11   ;;  %s1481_s11 = sphi %s1517_s11, %s2285_s11   ;;  %s1477_s10 = sphi %s1515_s10, %s2284_s10   ;;  %s1473_s9 = sphi %s1513_s9, %s2283_s9  }
   0x3   : > { %s16_s14 = ssub.s32 %s1481_s11, %s1530_s13  ;;  %s19_s15 = sadd.s32 1, %s1477_s10 }
   0x4   : > { %p17_p0 = scmp.eq.s32.totalorder %s16_s14, 0  ;;  %p26_p1 = scmp.ne.s32.totalorder %s1477_s10, %s1473_s9 }
   0x5   : > { %p27_p2 = scmp.eq.s32.totalorder %s1481_s11, 0  ;;  %p1246_p4 = scmp.ge.s32.totalorder %s1481_s11, 4 }
   0x6   : > { %s1539_s16 = scalar_select %p17_p0, %s1477_s10, %s19_s15  }
   0x7   : > { %p28_p3 = por %p27_p2, %p26_p1  ;;  %102 = sbr.rel (%p1246_p4) target bundleno = 20 (0x14), region = 20 }
   0xc   : > { %105 = sbr.rel (!%p28_p3) target bundleno = 20 (0x14), region = 24  ;;  %s107_s17 = sand.u32 (%p28_p3), 1, %s1477_s10  }
   0xd   : > { %s1309_s18 = sshll.u32 (%p28_p3), %s1481_s11, 4  ;;  %s1247_s19 = sshll.u32 (%p28_p3), %s107_s17, 5 }
   0xe   : > { %s112_s22 = scalar_lea.vmem (%p28_p3), %s2276_s0, %s1309_s18  ;;  %s109_s23 = scalar_lea.vmem (%p28_p3), [#allocation2], %s1247_s19 }
   0xf   : > { %v125_v0 = vld [vmem:[%s112_s22] sm:$0xff] (%p28_p3)  ;;  %v127_v1 = vld [vmem:[%s112_s22 + $0x8] sm:$0xff] (%p28_p3) }
  0x10   : > { %v129_v2 = vld [vmem:[%s112_s22 + $0x40] sm:$0xff] (%p28_p3)  ;;  %126 = vst [vmem:[%s109_s23] sm:$0xff] (%p28_p3), %v125_v0  ;;  %v131_v3 = vld [vmem:[%s112_s22 + $0x48] sm:$0xff] (%p28_p3) }
  0x11   : > { %128 = vst [vmem:[%s109_s23 + $0x8] sm:$0xff] %v127_v1 }
  0x12   : > { %130 = vst [vmem:[%s109_s23 + $0x10] sm:$0xff] %v129_v2 }
  0x13   : > { %132 = vst [vmem:[%s109_s23 + $0x18] sm:$0xff] %v131_v3 }
  0x14 PF: > { %p1250_p5 = scmp.ge.s32.totalorder %s1481_s11, 1  ;;  %p137_p6 = scmp.lt.s32.totalorder %s1481_s11, 5 }
  0x16   : > { %p138_p7 = pnand %p1250_p5, %p137_p6 }
  0x17   : > { %s144_s24 = sand.u32 (!%p138_p7), 1, %s1473_s9   ;;  %s1483_s27 = smov (!%p138_p7), 127  }
  0x18   : > { %141 = sbr.rel (%p138_p7) target bundleno = 2268 (0x8dc), region = 47  ;;  %s1251_s25 = sshll.u32 (!%p138_p7), %s144_s24, 5 }
  0x19   : > { %s146_s26 = scalar_lea.vmem (!%p138_p7), [#allocation2], %s1251_s25  ;;  %s1484_s28 = smov (!%p138_p7), 1  }
  0x1a   : > { %s1485_s3 = smov (!%p138_p7), 121   ;;  %s1493_s14 = smov (!%p138_p7), 126  }
  0x1b   : > { %s1494_s15 = smov (!%p138_p7), 2   ;;  %s1495_s17 = smov (!%p138_p7), 3  }
  0x1c   : > { %s1496_s18 = smov (!%p138_p7), 125  }
  0x1d   : > { %v1550_v4 = vld [vmem:[%s146_s26 + $0x10] sm:$0xff]  ;;  %v1552_v5 = vld [vmem:[%s146_s26] sm:$0xff]  ;;  %v1554_v6 = vld [vmem:[%s146_s26 + $0x18] sm:$0xff]  ;;  %v174_v11 = vlaneseq  ;;  %v1486_v13 = vmov 3   ;;  %v1487_v14 = vmov 5   ;;  %v1488_v16 = vmov 4  }
  0x1e   : > { %221 = vrot.lane.b32.xlu0 %v1550_v4, %s1483_s27  ;;  %219 = vrot.lane.b32.xlu1 %v1552_v5, %s1483_s27  ;;  %v1361_v7 = vpack.i.bf16 %v1554_v6, %v1550_v4  ;;  %v1563_v8 = vld [vmem:[%s146_s26 + $0x8] sm:$0xff]  ;;  %v195_v10 = vld [vmem:[%s2277_s1 + $0x18] sm:$0x1]  ;;  %v1489_v23 = vmov 1   ;;  %vm245_vm8 = vcmask 392192   ;;  %v1490_v47 = vmov 0  }
  0x1f   : > { %v1366_v9 = vpack.i.bf16 %v1563_v8, %v1552_v5  ;;  %v1579_v12 = vld [vmem:[%s2277_s1 + $0x18] sm:$0xff]  ;;  %1371 = vset.pattern.permute.xlu1 %v1486_v13  ;;  %1373 = vset.pattern.permute.xlu0 %v1487_v14  ;;  %v1586_v15 = vand.u32 127, %v174_v11  ;;  %v191_v46 = vld [vmem:[%s2277_s1] sm:$0xff]  ;;  %v1491_v48 = vmov 6   ;;  %v1492_v49 = vmov 2  }
  0x20   : > { %1362 = vrot.lane.b32.xlu2 %v1361_v7, %s1484_s28  ;;  %vm383_vm9 = vcmask 195584  }
  0x21   : > { %1372 = vset.pattern.permute.xlu2 %v1488_v16  ;;  %v176_v17 = vadd.s32 128, %v1586_v15  ;;  %v1592_v19 = vand.u32 31, %v1586_v15  ;;  %vm227_vm2 = vcmp.lt.s32.totalorder %v1586_v15, 127  ;;  %vm206_vm5 = vcmp.lt.s32.totalorder %v1586_v15, 1 }
  0x22   : > { %vm937_vm10 = vcmp.lt.s32.totalorder %v1586_v15, 3  ;;  %vm972_vm13 = vcmp.lt.s32.totalorder %v1586_v15, 2 }
  0x23   : > { %v1594_v22 = vand.u32 31, %v176_v17  ;;  %vm179_vm0 = vcmp.ge.s32.totalorder %v1592_v19, 31  ;;  %vm185_vm6 = vcmp.lt.s32.totalorder %v1592_v19, 1  ;;  %vm189_vm11 = vcmp.lt.s32.totalorder %v1592_v19, 3 }
  0x24   : > { %vm1603_vm3 = vmneg %vm179_vm0  ;;  %vm187_vm14 = vcmp.lt.s32.totalorder %v1592_v19, 2 }
  0x25   : > { %vm180_vm1 = vcmp.ge.s32.totalorder %v1594_v22, 31  ;;  %vm186_vm7 = vcmp.lt.s32.totalorder %v1594_v22, 1  ;;  %vm190_vm12 = vcmp.lt.s32.totalorder %v1594_v22, 3  ;;  %vm188_vm15 = vcmp.lt.s32.totalorder %v1594_v22, 2 }
  0x26   : > { %225 = vrot.lane.b32.xlu0 %v1554_v6, %s1483_s27  ;;  %223 = vrot.lane.b32.xlu1 %v1563_v8, %s1483_s27  ;;  %vm1609_vm4 = vmneg %vm180_vm1 }
  0x28   : > { %1367 = vrot.lane.b32.xlu2 %v1366_v9, %s1484_s28 }
  0x2e   : > { %290 = vrot.lane.b32.xlu0 %v195_v10, %s1485_s3  ;;  %242 = vperm.xlu1 %1371, %v1579_v12  }
  0x30   : > { %300 = vperm.xlu2 %1372, %v1579_v12  }
  0x36   : > { %306 = vperm.xlu0 %1373, %v1579_v12   ;;  %1374 = vset.pattern.permute.xlu1 %v1490_v47 }
  0x37   : > { %320 = vperm.xlu1 %1374, %v1579_v12  }
  0x38   : > { %1375 = vset.pattern.permute.xlu2 %v1489_v23 }
  0x39   : > { %326 = vperm.xlu2 %1375, %v1579_v12  }
  0x3e   : > { %1377 = vset.pattern.permute.xlu0 %v1491_v48 }
  0x3f   : > { %1396 = vset.pattern.permute.xlu1 %v1488_v16 }
  0x41   : > { %1376 = vset.pattern.permute.xlu2 %v1492_v49 }
  0x7a   : > { %v1363_v18 = vpop.permute.xlu2 %1362 }
  0x7b   : > { %v1365_v29 = vunpack.i.h.bf16 %v1363_v18  ;;  %v1364_v30 = vunpack.i.l.bf16 %v1363_v18 }
  0x7d   : > { %v210_v37 = vsel %vm206_vm5, %v1365_v29, %v1364_v30  ;;  %v208_v38 = vsel %vm206_vm5, %v1364_v30, %v1365_v29 }
  0x7e   : > { %v217_v42 = vsel %vm185_vm6, 1.0, %v210_v37  ;;  %v218_v43 = vsel %vm186_vm7, 1.0, %v208_v38 }
  0x82   : > { %v1368_v26 = vpop.permute.xlu2 %1367 }
  0x83   : > { %v1370_v33 = vunpack.i.h.bf16 %v1368_v26  ;;  %v1369_v34 = vunpack.i.l.bf16 %v1368_v26 }
  0x85   : > { %v209_v39 = vsel %vm206_vm5, %v1370_v33, %v1369_v34  ;;  %v207_v40 = vsel %vm206_vm5, %v1369_v34, %v1370_v33 }
  0x86   : > { %v215_v44 = vsel %vm185_vm6, 1.0, %v209_v39  ;;  %v216_v45 = vsel %vm186_vm7, 1.0, %v207_v40 }
  0x8a   : > { %v301_v59 = vpop.permute.xlu2 %300 }
  0x90   : > { %v222_v20 = vpop.permute.xlu0 %221  ;;  %v220_v21 = vpop.permute.xlu1 %219 }
  0x93   : > { %v327_v3 = vpop.permute.xlu2 %326 }
  0x98   : > { %v226_v27 = vpop.permute.xlu0 %225  ;;  %v224_v28 = vpop.permute.xlu1 %223 }
  0x99   : > { %v229_v31 = vsel %vm227_vm2, %v222_v20, %v226_v27  ;;  %v231_v32 = vsel %vm227_vm2, %v226_v27, %v222_v20  ;;  %v228_v35 = vsel %vm227_vm2, %v220_v21, %v224_v28  ;;  %v230_v36 = vsel %vm227_vm2, %v224_v28, %v220_v21 }
  0x9a   : > { %1254 = vmatpush.msk.msra.mxu0 %vm1603_vm3, %v229_v31  ;;  %1259 = vmatpush.msk.msra.mxu1 %vm1609_vm4, %v231_v32 }
  0x9c   : > { %1256 = vmatpush.msk.msra.mxu0 %vm1603_vm3, %v228_v35  ;;  %1261 = vmatpush.msk.msra.mxu1 %vm1609_vm4, %v230_v36 }
  0x9e   : > { %261 = vmatpush.msra.mxu0 %v1550_v4  ;;  %281 = vmatpush.msra.mxu1 %v1554_v6 }
  0xa0   : > { %262 = vmatpush.msra.mxu0 %v1552_v5  ;;  %282 = vmatpush.msra.mxu1 %v1563_v8  ;;  %v291_v41 = vpop.permute.xlu0 %290  ;;  %v243_v50 = vpop.permute.xlu1 %242 }
  0xa1   : > { %1316 = vpush %v291_v41 }
  0xa2   : > { %263 = vmatpush.msra.mxu0 %v217_v42  ;;  %283 = vmatpush.msra.mxu1 %v218_v43 }
  0xa4   : > { %264 = vmatpush.msra.mxu0 %v215_v44  ;;  %284 = vmatpush.msra.mxu1 %v216_v45 }
  0xa5   : > { %1257 = vmatmul.msk.f32.vlgmr.msra.gmra.mxu0 %vm245_vm8, %v191_v46  ;;  %1262 = vmatmul.msk.f32.vlgmr.msra.gmra.mxu1 %vm245_vm8, %v191_v46 }
  0xa8   : > { %v307_v60 = vpop.permute.xlu0 %306 }
  0xa9   : > { %v321_v2 = vpop.permute.xlu1 %320 }
  0xd2   : > { %s1317_s8 = spop %1316 }
  0xd3   : > { %v293_v53 = vstv %s1317_s8 }
 0x122   : > { %v266_v51 = vpop.f32.mrf.mxu0  ;;  %v286_v52 = vpop.f32.mrf.mxu1 }
 0x123   : > { %v267_v54 = vadd.f32 %v266_v51, %v243_v50  ;;  %v287_v55 = vadd.f32 %v286_v52, %v243_v50  ;;  %v196_v50 = vld [vmem:[%s2277_s1 + $0x20] sm:$0xff]  ;;  %v197_v51 = vld [vmem:[%s2277_s1 + $0x28] sm:$0xff] }
 0x125   : > { %v295_v56 = vmul.f32 %v293_v53, %v267_v54  ;;  %v296_v57 = vmul.f32 %v293_v53, %v287_v55 }
 0x127   : > { %1447 = vtanh.f32 %v295_v56 }
 0x128   : > { %1449 = vtanh.f32 %v296_v57 }
 0x12d   : > { %v1448_v58 = vpop.eup %1447 }
 0x12e   : > { %v1450_v61 = vpop.eup %1449  ;;  %v303_v62 = vmul.f32 %v1448_v58, %v301_v59 }
 0x12f   : > { %v304_v63 = vmul.f32 %v1450_v61, %v301_v59  ;;  %v192_v61 = vld [vmem:[%s2277_s1 + $0x8] sm:$0xff] }
 0x130   : > { %v309_v0 = vadd.f32 %v307_v60, %v303_v62 }
 0x131   : > { %v310_v1 = vadd.f32 %v307_v60, %v304_v63 }
 0x132   : > { %333 = vrot.lane.b32.xlu0 %v309_v0, %s1483_s27  ;;  %311 = vrot.lane.b32.xlu1 %v309_v0, %s1484_s28  ;;  %v329_v29 = vmul.f32 %v327_v3, %v309_v0  ;;  %v193_v0 = vld [vmem:[%s2277_s1 + $0x10] sm:$0xff] }
 0x133   : > { %313 = vrot.lane.b32.xlu2 %v310_v1, %s1484_s28  ;;  %v330_v30 = vmul.f32 %v327_v3, %v310_v1 }
 0x13a   : > { %335 = vrot.lane.b32.xlu1 %v310_v1, %s1483_s27  ;;  %350 = vperm.xlu0 %1377, %v1579_v12  }
 0x13b   : > { %342 = vperm.xlu2 %1376, %v1579_v12  }
 0x142   : > { %1384 = vset.pattern.permute.xlu0 %v1490_v47 }
 0x143   : > { %1383 = vset.pattern.permute.xlu2 %v1490_v47  ;;  %375 = vperm.xlu0 %1384, %v196_v50  }
 0x14b   : > { %1395 = vset.pattern.permute.xlu0 %v1486_v13 }
 0x18d   : > { %v314_v7 = vpop.permute.xlu2 %313 }
 0x195   : > { %v343_v28 = vpop.permute.xlu2 %342 }
 0x1a4   : > { %v312_v9 = vpop.permute.xlu1 %311  ;;  %v334_v18 = vpop.permute.xlu0 %333 }
 0x1a5   : > { %v315_v10 = vsel %vm206_vm5, %v312_v9, %v314_v7  ;;  %v316_v17 = vsel %vm206_vm5, %v314_v7, %v312_v9 }
 0x1a6   : > { %v317_v20 = vsel %vm185_vm6, 1.0, %v316_v17  ;;  %v318_v12 = vsel %vm186_vm7, 1.0, %v315_v10 }
 0x1a7   : > { %v323_v21 = vmul.f32 %v321_v2, %v317_v20  ;;  %v324_v26 = vmul.f32 %v321_v2, %v318_v12 }
 0x1a9   : > { %v331_v37 = vadd.f32 %v329_v29, %v323_v21  ;;  %v332_v38 = vadd.f32 %v330_v30, %v324_v26 }
 0x1ac   : > { %v336_v27 = vpop.permute.xlu1 %335  ;;  %v351_v39 = vpop.permute.xlu0 %350 }
 0x1ad   : > { %v337_v31 = vsel %vm227_vm2, %v334_v18, %v336_v27  ;;  %v338_v32 = vsel %vm227_vm2, %v336_v27, %v334_v18 }
 0x1ae   : > { %v339_v33 = vsel %vm179_vm0, 0.0, %v337_v31  ;;  %v340_v34 = vsel %vm180_vm1, 0.0, %v338_v32 }
 0x1af   : > { %v345_v35 = vmul.f32 %v343_v28, %v339_v33  ;;  %v346_v36 = vmul.f32 %v343_v28, %v340_v34  ;;  %v448_v33 = vld [vmem:[%s2277_s1 + $0x48] sm:$0x1] }
 0x1b1   : > { %v347_v40 = vadd.f32 %v345_v35, %v331_v37  ;;  %v348_v41 = vadd.f32 %v346_v36, %v332_v38 }
 0x1b3   : > { %v353_v42 = vadd.f32 %v351_v39, %v347_v40  ;;  %v354_v43 = vadd.f32 %v351_v39, %v348_v41 }
 0x1b5   : > { %v355_v44 = vmax.f32 %v353_v42, 0.0  ;;  %v356_v45 = vmax.f32 %v354_v43, 0.0  ;;  %v376_v18 = vpop.permute.xlu0 %375 }
 0x1b7   : > { %367 = vrot.lane.b32.xlu2 %v356_v45, %s1483_s27  ;;  %365 = vrot.lane.b32.xlu1 %v355_v44, %s1483_s27  ;;  %v1378_v46 = vpack.i.bf16 %v356_v45, %v355_v44 }
 0x1bf   : > { %1379 = vrot.lane.b32.xlu1 %v1378_v46, %s1484_s28  ;;  %380 = vperm.xlu2 %1383, %v197_v51  }
 0x1c7   : > { %1397 = vset.pattern.permute.xlu2 %v1487_v14 }
 0x211   : > { %v368_v52 = vpop.permute.xlu2 %367 }
 0x219   : > { %v381_v3 = vpop.permute.xlu2 %380 }
 0x229   : > { %v366_v53 = vpop.permute.xlu1 %365 }
 0x22a   : > { %v369_v54 = vsel %vm227_vm2, %v366_v53, %v368_v52  ;;  %v370_v55 = vsel %vm227_vm2, %v368_v52, %v366_v53 }
 0x22b   : > { %1264 = vmatpush.msk.msra.mxu2 %vm1603_vm3, %v369_v54  ;;  %1268 = vmatpush.msk.msra.mxu3 %vm1609_vm4, %v370_v55 }
 0x22d   : > { %404 = vmatpush.msra.mxu2 %v355_v44  ;;  %427 = vmatpush.msra.mxu3 %v356_v45 }
 0x231   : > { %v1380_v56 = vpop.permute.xlu1 %1379 }
 0x232   : > { %v1382_v57 = vunpack.i.h.bf16 %v1380_v56  ;;  %v1381_v58 = vunpack.i.l.bf16 %v1380_v56  ;;  %v444_v56 = vld [vmem:[%s2277_s1 + $0x30] sm:$0xff] }
 0x234   : > { %v362_v59 = vsel %vm206_vm5, %v1382_v57, %v1381_v58  ;;  %v361_v60 = vsel %vm206_vm5, %v1381_v58, %v1382_v57 }
 0x235   : > { %v363_v62 = vsel %vm185_vm6, 1.0, %v362_v59  ;;  %v364_v63 = vsel %vm186_vm7, 1.0, %v361_v60 }
 0x236   : > { %405 = vmatpush.msra.mxu2 %v363_v62  ;;  %428 = vmatpush.msra.mxu3 %v364_v63 }
 0x237   : > { %1265 = vmatmul.msk.f32.vlgmr.msra.gmra.mxu2 %vm383_vm9, %v192_v61  ;;  %1269 = vmatmul.msk.f32.vlgmr.msra.gmra.mxu3 %vm383_vm9, %v192_v61 }
 0x23f   : > { %1266 = vmatmul.msk.f32.gmra.mxu2 %vm383_vm9, %v193_v0  ;;  %1270 = vmatmul.msk.f32.gmra.mxu3 %vm383_vm9, %v193_v0 }
 0x2ba   : > { %v407_v1 = vpop.f32.mrf.mxu2  ;;  %v430_v2 = vpop.f32.mrf.mxu3 }
 0x2bb   : > { %v408_v21 = vadd.f32 %v407_v1, %v376_v18  ;;  %v431_v26 = vadd.f32 %v430_v2, %v376_v18 }
 0x2bd   : > { %v436_v30 = vmax.f32 %v408_v21, 0.0  ;;  %v437_v31 = vmax.f32 %v431_v26, 0.0 }
 0x2bf   : > { %v1737_v32 = vadd.f32 %v436_v30, %v1552_v5  ;;  %v1756_v5 = vld [vmem:[%s2277_s1 + $0x48] sm:$0xff] }
 0x2c2   : > { %v410_v7 = vpop.f32.mrf.mxu2  ;;  %v433_v9 = vpop.f32.mrf.mxu3 }
 0x2c3   : > { %v411_v10 = vadd.f32 %v410_v7, %v381_v3  ;;  %v434_v17 = vadd.f32 %v433_v9, %v381_v3 }
 0x2c5   : > { %v438_v20 = vmax.f32 %v411_v10, 0.0  ;;  %v439_v12 = vmax.f32 %v434_v17, 0.0 }
 0x2c7   : > { %v1724_v27 = vadd.f32 %v438_v20, %v1550_v4  ;;  %v1727_v28 = vadd.f32 %v439_v12, %v1554_v6  ;;  %v1740_v4 = vadd.f32 %v437_v31, %v1563_v8 }
 0x2c9   : > { %469 = vrot.lane.b32.xlu1 %v1724_v27, %s1483_s27  ;;  %473 = vrot.lane.b32.xlu2 %v1727_v28, %s1483_s27  ;;  %v1385_v29 = vpack.i.bf16 %v1727_v28, %v1724_v27  ;;  %v1390_v6 = vpack.i.bf16 %v1740_v4, %v1737_v32 }
 0x2cb   : > { %1386 = vrot.lane.b32.xlu0 %v1385_v29, %s1484_s28 }
 0x2d1   : > { %467 = vrot.lane.b32.xlu1 %v1737_v32, %s1483_s27  ;;  %471 = vrot.lane.b32.xlu2 %v1740_v4, %s1483_s27 }
 0x2d3   : > { %485 = vperm.xlu0 %1395, %v1756_v5  }
 0x2d9   : > { %1391 = vrot.lane.b32.xlu1 %v1390_v6, %s1484_s28  ;;  %532 = vrot.lane.b32.xlu2 %v448_v33, %s1485_s3 }
 0x2db   : > { %1398 = vset.pattern.permute.xlu0 %v1490_v47 }
 0x2dc   : > { %562 = vperm.xlu0 %1398, %v1756_v5  }
 0x2e1   : > { %542 = vperm.xlu1 %1396, %v1756_v5   ;;  %548 = vperm.xlu2 %1397, %v1756_v5  }
 0x2e4   : > { %1401 = vset.pattern.permute.xlu0 %v1491_v48 }
 0x2e5   : > { %592 = vperm.xlu0 %1401, %v1756_v5  }
 0x2e9   : > { %1399 = vset.pattern.permute.xlu1 %v1489_v23  ;;  %1400 = vset.pattern.permute.xlu2 %v1492_v49 }
 0x2ea   : > { %568 = vperm.xlu1 %1399, %v1756_v5  }
 0x2ed   : > { %1408 = vset.pattern.permute.xlu0 %v1490_v47 }
 0x2f2   : > { %1420 = vset.pattern.permute.xlu1 %v1488_v16 }
 0x323   : > { %v474_v8 = vpop.permute.xlu2 %473 }
 0x32b   : > { %v472_v38 = vpop.permute.xlu2 %471 }
 0x333   : > { %v533_v59 = vpop.permute.xlu2 %532 }
 0x334   : > { %1318 = vpush %v533_v59 }
 0x33b   : > { %v470_v34 = vpop.permute.xlu1 %469  ;;  %v549_v10 = vpop.permute.xlu2 %548 }
 0x33c   : > { %v476_v35 = vsel %vm227_vm2, %v470_v34, %v474_v8  ;;  %v478_v36 = vsel %vm227_vm2, %v474_v8, %v470_v34 }
 0x33d   : > { %1272 = vmatpush.msk.msrb.mxu2 %vm1603_vm3, %v476_v35  ;;  %1277 = vmatpush.msk.msrb.mxu3 %vm1609_vm4, %v478_v36  ;;  %v1387_v37 = vpop.permute.xlu0 %1386 }
 0x33e   : > { %v1389_v39 = vunpack.i.h.bf16 %v1387_v37  ;;  %v1388_v40 = vunpack.i.l.bf16 %v1387_v37 }
 0x340   : > { %v462_v44 = vsel %vm206_vm5, %v1389_v39, %v1388_v40  ;;  %v460_v45 = vsel %vm206_vm5, %v1388_v40, %v1389_v39 }
 0x341   : > { %v465_v46 = vsel %vm185_vm6, 1.0, %v462_v44  ;;  %v466_v50 = vsel %vm186_vm7, 1.0, %v460_v45 }
 0x343   : > { %v468_v41 = vpop.permute.xlu1 %467 }
 0x344   : > { %v475_v42 = vsel %vm227_vm2, %v468_v41, %v472_v38  ;;  %v477_v43 = vsel %vm227_vm2, %v472_v38, %v468_v41 }
 0x345   : > { %1274 = vmatpush.msk.msrb.mxu2 %vm1603_vm3, %v475_v42  ;;  %1279 = vmatpush.msk.msrb.mxu3 %vm1609_vm4, %v477_v43  ;;  %v486_v60 = vpop.permute.xlu0 %485 }
 0x347   : > { %503 = vmatpush.msrb.mxu2 %v1724_v27  ;;  %523 = vmatpush.msrb.mxu3 %v1727_v28 }
 0x349   : > { %504 = vmatpush.msrb.mxu2 %v1737_v32  ;;  %524 = vmatpush.msrb.mxu3 %v1740_v4 }
 0x34b   : > { %v1392_v51 = vpop.permute.xlu1 %1391  ;;  %505 = vmatpush.msrb.mxu2 %v465_v46  ;;  %525 = vmatpush.msrb.mxu3 %v466_v50 }
 0x34c   : > { %v1394_v52 = vunpack.i.h.bf16 %v1392_v51  ;;  %v1393_v53 = vunpack.i.l.bf16 %v1392_v51 }
 0x34e   : > { %v461_v54 = vsel %vm206_vm5, %v1394_v52, %v1393_v53  ;;  %v459_v55 = vsel %vm206_vm5, %v1393_v53, %v1394_v52  ;;  %v563_v8 = vpop.permute.xlu0 %562 }
 0x34f   : > { %v463_v57 = vsel %vm185_vm6, 1.0, %v461_v54  ;;  %v464_v58 = vsel %vm186_vm7, 1.0, %v459_v55 }
 0x350   : > { %506 = vmatpush.msrb.mxu2 %v463_v57  ;;  %526 = vmatpush.msrb.mxu3 %v464_v58 }
 0x351   : > { %1275 = vmatmul.msk.f32.vlgmr.msrb.gmra.mxu2 %vm245_vm8, %v444_v56  ;;  %1280 = vmatmul.msk.f32.vlgmr.msrb.gmra.mxu3 %vm245_vm8, %v444_v56 }
 0x353   : > { %v543_v9 = vpop.permute.xlu1 %542 }
 0x357   : > { %v593_v52 = vpop.permute.xlu0 %592 }
 0x35c   : > { %v569_v29 = vpop.permute.xlu1 %568 }
 0x365   : > { %s1319_s30 = spop %1318 }
 0x366   : > { %v535_v63 = vstv %s1319_s30 }
 0x3d4   : > { %v508_v61 = vpop.f32.mrf.mxu2  ;;  %v528_v62 = vpop.f32.mrf.mxu3 }
 0x3d5   : > { %v509_v0 = vadd.f32 %v508_v61, %v486_v60  ;;  %v529_v1 = vadd.f32 %v528_v62, %v486_v60  ;;  %v449_v60 = vld [vmem:[%s2277_s1 + $0x50] sm:$0xff]  ;;  %v450_v61 = vld [vmem:[%s2277_s1 + $0x58] sm:$0xff] }
 0x3d6   : > { %617 = vperm.xlu0 %1408, %v449_v60  }
 0x3d7   : > { %v537_v2 = vmul.f32 %v535_v63, %v509_v0  ;;  %v538_v3 = vmul.f32 %v535_v63, %v529_v1 }
 0x3d9   : > { %1451 = vtanh.f32 %v537_v2 }
 0x3da   : > { %1453 = vtanh.f32 %v538_v3 }
 0x3de   : > { %1419 = vset.pattern.permute.xlu0 %v1486_v13 }
 0x3df   : > { %v1452_v7 = vpop.eup %1451 }
 0x3e0   : > { %v1454_v17 = vpop.eup %1453  ;;  %v545_v18 = vmul.f32 %v1452_v7, %v543_v9 }
 0x3e1   : > { %v546_v20 = vmul.f32 %v1454_v17, %v543_v9 }
 0x3e2   : > { %v551_v12 = vadd.f32 %v549_v10, %v545_v18 }
 0x3e3   : > { %v552_v21 = vadd.f32 %v549_v10, %v546_v20  ;;  %v445_v20 = vld [vmem:[%s2277_s1 + $0x38] sm:$0xff] }
 0x3e4   : > { %553 = vrot.lane.b32.xlu1 %v551_v12, %s1484_s28  ;;  %v571_v39 = vmul.f32 %v569_v29, %v551_v12 }
 0x3e5   : > { %555 = vrot.lane.b32.xlu2 %v552_v21, %s1484_s28  ;;  %v572_v40 = vmul.f32 %v569_v29, %v552_v21 }
 0x3ec   : > { %577 = vrot.lane.b32.xlu1 %v552_v21, %s1483_s27 }
 0x3ed   : > { %575 = vrot.lane.b32.xlu2 %v551_v12, %s1483_s27  ;;  %v446_v12 = vld [vmem:[%s2277_s1 + $0x40] sm:$0xff] }
 0x3f5   : > { %584 = vperm.xlu2 %1400, %v1756_v5  }
 0x3fd   : > { %1407 = vset.pattern.permute.xlu2 %v1490_v47 }
 0x43f   : > { %v556_v26 = vpop.permute.xlu2 %555 }
 0x447   : > { %v576_v30 = vpop.permute.xlu2 %575 }
 0x44f   : > { %v585_v38 = vpop.permute.xlu2 %584 }
 0x456   : > { %v554_v31 = vpop.permute.xlu1 %553 }
 0x457   : > { %v557_v6 = vsel %vm206_vm5, %v554_v31, %v556_v26  ;;  %v558_v33 = vsel %vm206_vm5, %v556_v26, %v554_v31  ;;  %v618_v31 = vpop.permute.xlu0 %617 }
 0x458   : > { %v559_v34 = vsel %vm185_vm6, 1.0, %v558_v33  ;;  %v560_v35 = vsel %vm186_vm7, 1.0, %v557_v6 }
 0x459   : > { %v565_v5 = vmul.f32 %v563_v8, %v559_v34  ;;  %v566_v36 = vmul.f32 %v563_v8, %v560_v35 }
 0x45b   : > { %v573_v45 = vadd.f32 %v571_v39, %v565_v5  ;;  %v574_v46 = vadd.f32 %v572_v40, %v566_v36 }
 0x45e   : > { %v578_v37 = vpop.permute.xlu1 %577 }
 0x45f   : > { %v579_v41 = vsel %vm227_vm2, %v576_v30, %v578_v37  ;;  %v580_v42 = vsel %vm227_vm2, %v578_v37, %v576_v30 }
 0x460   : > { %v581_v43 = vsel %vm179_vm0, 0.0, %v579_v41  ;;  %v582_v44 = vsel %vm180_vm1, 0.0, %v580_v42 }
 0x461   : > { %v587_v50 = vmul.f32 %v585_v38, %v581_v43  ;;  %v588_v51 = vmul.f32 %v585_v38, %v582_v44  ;;  %v689_v43 = vld [vmem:[%s2277_s1 + $0x78] sm:$0x1] }
 0x463   : > { %v589_v53 = vadd.f32 %v587_v50, %v573_v45  ;;  %v590_v54 = vadd.f32 %v588_v51, %v574_v46 }
 0x465   : > { %v595_v55 = vadd.f32 %v593_v52, %v589_v53  ;;  %v596_v56 = vadd.f32 %v593_v52, %v590_v54 }
 0x467   : > { %v597_v57 = vmax.f32 %v595_v55, 0.0  ;;  %v598_v58 = vmax.f32 %v596_v56, 0.0 }
 0x469   : > { %609 = vrot.lane.b32.xlu2 %v598_v58, %s1483_s27  ;;  %607 = vrot.lane.b32.xlu1 %v597_v57, %s1483_s27  ;;  %v1402_v59 = vpack.i.bf16 %v598_v58, %v597_v57 }
 0x471   : > { %1403 = vrot.lane.b32.xlu1 %v1402_v59, %s1484_s28  ;;  %622 = vperm.xlu2 %1407, %v450_v61  }
 0x479   : > { %1421 = vset.pattern.permute.xlu2 %v1487_v14 }
 0x4c3   : > { %v610_v62 = vpop.permute.xlu2 %609 }
 0x4cb   : > { %v623_v21 = vpop.permute.xlu2 %622 }
 0x4db   : > { %v608_v63 = vpop.permute.xlu1 %607 }
 0x4dc   : > { %v611_v0 = vsel %vm227_vm2, %v608_v63, %v610_v62  ;;  %v612_v1 = vsel %vm227_vm2, %v610_v62, %v608_v63 }
 0x4dd   : > { %1282 = vmatpush.msk.msrb.mxu0 %vm1603_vm3, %v611_v0  ;;  %1310 = vmatpush.msk.msra.mxu2 %vm1603_vm3, %v611_v0 }
 0x4de   : > { %1286 = vmatpush.msk.msrb.mxu1 %vm1609_vm4, %v612_v1  ;;  %1313 = vmatpush.msk.msra.mxu3 %vm1609_vm4, %v612_v1 }
 0x4df   : > { %645 = vmatpush.msrb.mxu0 %v597_v57  ;;  %1311 = vmatpush.msra.mxu2 %v597_v57 }
 0x4e0   : > { %668 = vmatpush.msrb.mxu1 %v598_v58  ;;  %1314 = vmatpush.msra.mxu3 %v598_v58 }
 0x4e3   : > { %v1404_v2 = vpop.permute.xlu1 %1403 }
 0x4e4   : > { %v1406_v3 = vunpack.i.h.bf16 %v1404_v2  ;;  %v1405_v7 = vunpack.i.l.bf16 %v1404_v2  ;;  %v685_v2 = vld [vmem:[%s2277_s1 + $0x60] sm:$0xff] }
 0x4e6   : > { %v604_v9 = vsel %vm206_vm5, %v1406_v3, %v1405_v7  ;;  %v603_v10 = vsel %vm206_vm5, %v1405_v7, %v1406_v3 }
 0x4e7   : > { %v605_v17 = vsel %vm185_vm6, 1.0, %v604_v9  ;;  %v606_v18 = vsel %vm186_vm7, 1.0, %v603_v10 }
 0x4e8   : > { %646 = vmatpush.msrb.mxu0 %v605_v17  ;;  %1312 = vmatpush.msra.mxu2 %v605_v17 }
 0x4e9   : > { %669 = vmatpush.msrb.mxu1 %v606_v18  ;;  %1315 = vmatpush.msra.mxu3 %v606_v18 }
 0x4ea   : > { %1283 = vmatmul.msk.f32.vlgmr.msrb.gmra.mxu0 %vm383_vm9, %v445_v20  ;;  %1284 = vmatmul.msk.f32.vlgmr.msra.gmra.mxu2 %vm383_vm9, %v446_v12 }
 0x4eb   : > { %1287 = vmatmul.msk.f32.vlgmr.msrb.gmra.mxu1 %vm383_vm9, %v445_v20  ;;  %1288 = vmatmul.msk.f32.vlgmr.msra.gmra.mxu3 %vm383_vm9, %v446_v12 }
 0x567   : > { %v648_v6 = vpop.f32.mrf.mxu0 }
 0x568   : > { %v671_v8 = vpop.f32.mrf.mxu1  ;;  %v649_v5 = vadd.f32 %v648_v6, %v618_v31 }
 0x569   : > { %v672_v37 = vadd.f32 %v671_v8, %v618_v31 }
 0x56a   : > { %v677_v40 = vmax.f32 %v649_v5, 0.0 }
 0x56b   : > { %v678_v41 = vmax.f32 %v672_v37, 0.0 }
 0x56d   : > { %v651_v26 = vpop.f32.mrf.mxu2  ;;  %v1891_v42 = vadd.f32 %v678_v41, %v1740_v4 }
 0x56e   : > { %v652_v29 = vadd.f32 %v651_v26, %v623_v21  ;;  %v674_v30 = vpop.f32.mrf.mxu3 }
 0x56f   : > { %v675_v33 = vadd.f32 %v674_v30, %v623_v21 }
 0x570   : > { %v679_v34 = vmax.f32 %v652_v29, 0.0 }
 0x571   : > { %v680_v35 = vmax.f32 %v675_v33, 0.0 }
 0x572   : > { %v1875_v36 = vadd.f32 %v679_v34, %v1724_v27  ;;  %v1888_v27 = vadd.f32 %v677_v40, %v1737_v32  ;;  %v1907_v32 = vld [vmem:[%s2277_s1 + $0x78] sm:$0xff] }
 0x573   : > { %v1878_v38 = vadd.f32 %v680_v35, %v1727_v28 }
 0x574   : > { %710 = vrot.lane.b32.xlu1 %v1875_v36, %s1483_s27  ;;  %v1414_v28 = vpack.i.bf16 %v1891_v42, %v1888_v27 }
 0x575   : > { %714 = vrot.lane.b32.xlu2 %v1878_v38, %s1483_s27  ;;  %v1409_v39 = vpack.i.bf16 %v1878_v38, %v1875_v36 }
 0x577   : > { %1410 = vrot.lane.b32.xlu0 %v1409_v39, %s1484_s28 }
 0x57c   : > { %708 = vrot.lane.b32.xlu1 %v1888_v27, %s1483_s27 }
 0x57d   : > { %712 = vrot.lane.b32.xlu2 %v1891_v42, %s1483_s27 }
 0x57f   : > { %726 = vperm.xlu0 %1419, %v1907_v32  }
 0x584   : > { %1415 = vrot.lane.b32.xlu1 %v1414_v28, %s1484_s28 }
 0x585   : > { %773 = vrot.lane.b32.xlu2 %v689_v43, %s1485_s3 }
 0x587   : > { %1422 = vset.pattern.permute.xlu0 %v1490_v47 }
 0x588   : > { %803 = vperm.xlu0 %1422, %v1907_v32  }
 0x58c   : > { %783 = vperm.xlu1 %1420, %v1907_v32  }
 0x58d   : > { %789 = vperm.xlu2 %1421, %v1907_v32  }
 0x590   : > { %1425 = vset.pattern.permute.xlu0 %v1491_v48 }
 0x591   : > { %833 = vperm.xlu0 %1425, %v1907_v32  }
 0x594   : > { %1423 = vset.pattern.permute.xlu1 %v1489_v23 }
 0x595   : > { %809 = vperm.xlu1 %1423, %v1907_v32   ;;  %1424 = vset.pattern.permute.xlu2 %v1492_v49 }
 0x599   : > { %1432 = vset.pattern.permute.xlu0 %v1490_v47 }
 0x59d   : > { %1433 = vset.pattern.permute.xlu1 %v1490_v47 }
 0x5cf   : > { %v715_v4 = vpop.permute.xlu2 %714 }
 0x5d7   : > { %v713_v51 = vpop.permute.xlu2 %712 }
 0x5df   : > { %v774_v9 = vpop.permute.xlu2 %773 }
 0x5e0   : > { %1320 = vpush %v774_v9  ;;  %v691_v9 = vld [vmem:[%s2277_s1 + $0x88] sm:$0xff] }
 0x5e1   : > { %863 = vperm.xlu0 %1432, %v691_v9  }
 0x5e6   : > { %v711_v44 = vpop.permute.xlu1 %710 }
 0x5e7   : > { %v717_v45 = vsel %vm227_vm2, %v711_v44, %v715_v4  ;;  %v719_v46 = vsel %vm227_vm2, %v715_v4, %v711_v44  ;;  %v790_v6 = vpop.permute.xlu2 %789 }
 0x5e8   : > { %1290 = vmatpush.msk.msrb.mxu2 %vm1603_vm3, %v717_v45  ;;  %1295 = vmatpush.msk.msrb.mxu3 %vm1609_vm4, %v719_v46 }
 0x5e9   : > { %v1411_v50 = vpop.permute.xlu0 %1410 }
 0x5ea   : > { %v1413_v52 = vunpack.i.h.bf16 %v1411_v50  ;;  %v1412_v53 = vunpack.i.l.bf16 %v1411_v50 }
 0x5ec   : > { %v703_v57 = vsel %vm206_vm5, %v1413_v52, %v1412_v53  ;;  %v701_v58 = vsel %vm206_vm5, %v1412_v53, %v1413_v52 }
 0x5ed   : > { %v706_v59 = vsel %vm185_vm6, 1.0, %v703_v57  ;;  %v707_v60 = vsel %vm186_vm7, 1.0, %v701_v58 }
 0x5ee   : > { %v709_v54 = vpop.permute.xlu1 %708 }
 0x5ef   : > { %v716_v55 = vsel %vm227_vm2, %v709_v54, %v713_v51  ;;  %v718_v56 = vsel %vm227_vm2, %v713_v51, %v709_v54 }
 0x5f0   : > { %1292 = vmatpush.msk.msrb.mxu2 %vm1603_vm3, %v716_v55  ;;  %1297 = vmatpush.msk.msrb.mxu3 %vm1609_vm4, %v718_v56 }
 0x5f1   : > { %v727_v10 = vpop.permute.xlu0 %726 }
 0x5f2   : > { %744 = vmatpush.msrb.mxu2 %v1875_v36  ;;  %764 = vmatpush.msrb.mxu3 %v1878_v38 }
 0x5f4   : > { %745 = vmatpush.msrb.mxu2 %v1888_v27  ;;  %765 = vmatpush.msrb.mxu3 %v1891_v42 }
 0x5f6   : > { %v1416_v61 = vpop.permute.xlu1 %1415  ;;  %746 = vmatpush.msrb.mxu2 %v706_v59  ;;  %766 = vmatpush.msrb.mxu3 %v707_v60 }
 0x5f7   : > { %v1418_v62 = vunpack.i.h.bf16 %v1416_v61  ;;  %v1417_v63 = vunpack.i.l.bf16 %v1416_v61 }
 0x5f9   : > { %v702_v0 = vsel %vm206_vm5, %v1418_v62, %v1417_v63  ;;  %v700_v1 = vsel %vm206_vm5, %v1417_v63, %v1418_v62 }
 0x5fa   : > { %v704_v3 = vsel %vm185_vm6, 1.0, %v702_v0  ;;  %v705_v7 = vsel %vm186_vm7, 1.0, %v700_v1  ;;  %v804_v4 = vpop.permute.xlu0 %803 }
 0x5fb   : > { %747 = vmatpush.msrb.mxu2 %v704_v3  ;;  %767 = vmatpush.msrb.mxu3 %v705_v7 }
 0x5fc   : > { %1293 = vmatmul.msk.f32.vlgmr.msrb.gmra.mxu2 %vm245_vm8, %v685_v2  ;;  %1298 = vmatmul.msk.f32.vlgmr.msrb.gmra.mxu3 %vm245_vm8, %v685_v2 }
 0x5fe   : > { %v784_v31 = vpop.permute.xlu1 %783 }
 0x603   : > { %v834_v61 = vpop.permute.xlu0 %833 }
 0x607   : > { %v810_v39 = vpop.permute.xlu1 %809 }
 0x611   : > { %s1321_s22 = spop %1320 }
 0x612   : > { %v776_v20 = vstv %s1321_s22 }
 0x67f   : > { %v749_v17 = vpop.f32.mrf.mxu2  ;;  %v769_v18 = vpop.f32.mrf.mxu3 }
 0x680   : > { %v750_v12 = vadd.f32 %v749_v17, %v727_v10  ;;  %v770_v21 = vadd.f32 %v769_v18, %v727_v10  ;;  %v1993_v10 = vld [vmem:[%s2277_s1 + $0x98] sm:$0xff]  ;;  %v1999_v17 = vld [vmem:[%s2277_s1 + $0x90] sm:$0xff]  ;;  %v690_v18 = vld [vmem:[%s2277_s1 + $0x80] sm:$0xff] }
 0x681   : > { %952 = vperm.xlu0 %1432, %v1999_v17  }
 0x682   : > { %v778_v26 = vmul.f32 %v776_v20, %v750_v12  ;;  %v779_v29 = vmul.f32 %v776_v20, %v770_v21 }
 0x684   : > { %1455 = vtanh.f32 %v778_v26 }
 0x685   : > { %1457 = vtanh.f32 %v779_v29 }
 0x689   : > { %1434 = vset.pattern.permute.xlu0 %v1489_v23 }
 0x68a   : > { %v1456_v30 = vpop.eup %1455  ;;  %986 = vperm.xlu0 %1434, %v1999_v17  }
 0x68b   : > { %v1458_v33 = vpop.eup %1457  ;;  %v786_v8 = vmul.f32 %v1456_v30, %v784_v31  ;;  %v686_v30 = vld [vmem:[%s2277_s1 + $0x68] sm:$0xff] }
 0x68c   : > { %v787_v34 = vmul.f32 %v1458_v33, %v784_v31 }
 0x68d   : > { %v792_v35 = vadd.f32 %v790_v6, %v786_v8 }
 0x68e   : > { %v793_v5 = vadd.f32 %v790_v6, %v787_v34  ;;  %v687_v6 = vld [vmem:[%s2277_s1 + $0x70] sm:$0xff] }
 0x68f   : > { %794 = vrot.lane.b32.xlu1 %v792_v35, %s1484_s28  ;;  %v812_v51 = vmul.f32 %v810_v39, %v792_v35 }
 0x690   : > { %796 = vrot.lane.b32.xlu2 %v793_v5, %s1484_s28  ;;  %v813_v52 = vmul.f32 %v810_v39, %v793_v5 }
 0x692   : > { %1438 = vset.pattern.permute.xlu0 %v1486_v13 }
 0x693   : > { %1034 = vperm.xlu0 %1438, %v1999_v17  }
 0x697   : > { %818 = vrot.lane.b32.xlu1 %v793_v5, %s1483_s27 }
 0x698   : > { %816 = vrot.lane.b32.xlu2 %v792_v35, %s1483_s27 }
 0x6a0   : > { %825 = vperm.xlu2 %1424, %v1907_v32  }
 0x6a8   : > { %1431 = vset.pattern.permute.xlu2 %v1490_v47 }
 0x6ea   : > { %v797_v37 = vpop.permute.xlu2 %796 }
 0x6f2   : > { %v817_v40 = vpop.permute.xlu2 %816 }
 0x6fa   : > { %v826_v50 = vpop.permute.xlu2 %825 }
 0x701   : > { %v795_v41 = vpop.permute.xlu1 %794 }
 0x702   : > { %v798_v28 = vsel %vm206_vm5, %v795_v41, %v797_v37  ;;  %v799_v43 = vsel %vm206_vm5, %v797_v37, %v795_v41  ;;  %v864_v41 = vpop.permute.xlu0 %863 }
 0x703   : > { %v800_v44 = vsel %vm185_vm6, 1.0, %v799_v43  ;;  %v801_v45 = vsel %vm186_vm7, 1.0, %v798_v28 }
 0x704   : > { %v806_v32 = vmul.f32 %v804_v4, %v800_v44  ;;  %v807_v46 = vmul.f32 %v804_v4, %v801_v45 }
 0x706   : > { %v814_v57 = vadd.f32 %v812_v51, %v806_v32  ;;  %v815_v58 = vadd.f32 %v813_v52, %v807_v46 }
 0x709   : > { %v819_v47 = vpop.permute.xlu1 %818 }
 0x70a   : > { %v820_v53 = vsel %vm227_vm2, %v817_v40, %v819_v47  ;;  %v821_v54 = vsel %vm227_vm2, %v819_v47, %v817_v40 }
 0x70b   : > { %v822_v55 = vsel %vm179_vm0, 0.0, %v820_v53  ;;  %v823_v56 = vsel %vm180_vm1, 0.0, %v821_v54 }
 0x70c   : > { %v828_v59 = vmul.f32 %v826_v50, %v822_v55  ;;  %v829_v60 = vmul.f32 %v826_v50, %v823_v56  ;;  %v953_v55 = vpop.permute.xlu0 %952 }
 0x70e   : > { %v830_v62 = vadd.f32 %v828_v59, %v814_v57  ;;  %v831_v63 = vadd.f32 %v829_v60, %v815_v58 }
 0x710   : > { %v836_v0 = vadd.f32 %v834_v61, %v830_v62  ;;  %v837_v1 = vadd.f32 %v834_v61, %v831_v63 }
 0x712   : > { %v838_v2 = vmax.f32 %v836_v0, 0.0  ;;  %v839_v3 = vmax.f32 %v837_v1, 0.0 }
 0x714   : > { %850 = vrot.lane.b32.xlu2 %v839_v3, %s1483_s27  ;;  %848 = vrot.lane.b32.xlu1 %v838_v2, %s1483_s27  ;;  %v1426_v7 = vpack.i.bf16 %v839_v3, %v838_v2  ;;  %v987_v58 = vpop.permute.xlu0 %986 }
 0x71c   : > { %1427 = vrot.lane.b32.xlu1 %v1426_v7, %s1484_s28  ;;  %858 = vperm.xlu2 %1431, %v690_v18   ;;  %v1035_v61 = vpop.permute.xlu0 %1034 }
 0x724   : > { %957 = vperm.xlu1 %1433, %v1993_v10   ;;  %1437 = vset.pattern.permute.xlu2 %v1492_v49 }
 0x725   : > { %1022 = vperm.xlu2 %1437, %v1993_v10  }
 0x72c   : > { %1435 = vset.pattern.permute.xlu1 %v1489_v23 }
 0x72d   : > { %990 = vperm.xlu1 %1435, %v1993_v10   ;;  %1441 = vset.pattern.permute.xlu2 %v1488_v16 }
 0x72e   : > { %1070 = vperm.xlu2 %1441, %v1993_v10  }
 0x735   : > { %1436 = vset.pattern.permute.xlu1 %v1492_v49 }
 0x736   : > { %1018 = vperm.xlu1 %1436, %v1999_v17   ;;  %1443 = vset.pattern.permute.xlu2 %v1487_v14 }
 0x737   : > { %1107 = vperm.xlu2 %1443, %v1993_v10  }
 0x73e   : > { %1439 = vset.pattern.permute.xlu1 %v1486_v13 }
 0x73f   : > { %1038 = vperm.xlu1 %1439, %v1993_v10   ;;  %1445 = vset.pattern.permute.xlu2 %v1491_v48 }
 0x747   : > { %1440 = vset.pattern.permute.xlu1 %v1488_v16 }
 0x748   : > { %1066 = vperm.xlu1 %1440, %v1999_v17  }
 0x750   : > { %1442 = vset.pattern.permute.xlu1 %v1487_v14 }
 0x751   : > { %1103 = vperm.xlu1 %1442, %v1999_v17  }
 0x759   : > { %1444 = vset.pattern.permute.xlu1 %v1491_v48 }
 0x76e   : > { %v851_v20 = vpop.permute.xlu2 %850 }
 0x776   : > { %v859_v8 = vpop.permute.xlu2 %858 }
 0x786   : > { %v849_v12 = vpop.permute.xlu1 %848 }
 0x787   : > { %v852_v23 = vsel %vm227_vm2, %v849_v12, %v851_v20  ;;  %v853_v21 = vsel %vm227_vm2, %v851_v20, %v849_v12 }
 0x788   : > { %1300 = vmatpush.msk.msra.mxu0 %vm1603_vm3, %v852_v23  ;;  %1304 = vmatpush.msk.msra.mxu1 %vm1609_vm4, %v853_v21  ;;  %vm1089_vm3 = vcmp.lt.s32.totalorder %v1586_v15, 126  ;;  %vm181_vm4 = vcmp.ge.s32.totalorder %v1592_v19, 30 }
 0x78a   : > { %886 = vmatpush.msra.mxu0 %v838_v2  ;;  %909 = vmatpush.msra.mxu1 %v839_v3 }
 0x78e   : > { %v1428_v49 = vpop.permute.xlu1 %1427 }
 0x78f   : > { %v1430_v26 = vunpack.i.h.bf16 %v1428_v49  ;;  %v1429_v29 = vunpack.i.l.bf16 %v1428_v49 }
 0x791   : > { %v845_v24 = vsel %vm206_vm5, %v1430_v26, %v1429_v29  ;;  %v844_v25 = vsel %vm206_vm5, %v1429_v29, %v1430_v26 }
 0x792   : > { %v846_v13 = vsel %vm185_vm6, 1.0, %v845_v24  ;;  %v847_v31 = vsel %vm186_vm7, 1.0, %v844_v25 }
 0x793   : > { %887 = vmatpush.msra.mxu0 %v846_v13  ;;  %910 = vmatpush.msra.mxu1 %v847_v31 }
 0x794   : > { %1301 = vmatmul.msk.f32.vlgmr.msra.gmra.mxu0 %vm383_vm9, %v686_v30  ;;  %1305 = vmatmul.msk.f32.vlgmr.msra.gmra.mxu1 %vm383_vm9, %v686_v30 }
 0x796   : > { %v2053_v16 = vpop.permute.xlu1 %957 }
 0x79c   : > { %1302 = vmatmul.msk.f32.gmra.mxu0 %vm383_vm9, %v687_v6  ;;  %1306 = vmatmul.msk.f32.gmra.mxu1 %vm383_vm9, %v687_v6 }
 0x79f   : > { %v2055_v33 = vpop.permute.xlu1 %990 }
 0x7a8   : > { %v2057_v37 = vpop.permute.xlu1 %1018 }
 0x7b1   : > { %v1039_v32 = vpop.permute.xlu1 %1038 }
 0x7ba   : > { %v1067_v57 = vpop.permute.xlu1 %1066 }
 0x7c3   : > { %v2114_v60 = vpop.permute.xlu1 %1103 }
 0x811   : > { %v889_v34 = vpop.f32.mrf.mxu0  ;;  %v912_v35 = vpop.f32.mrf.mxu1 }
 0x812   : > { %v890_v5 = vadd.f32 %v889_v34, %v859_v8  ;;  %v913_v14 = vadd.f32 %v912_v35, %v859_v8 }
 0x814   : > { %v918_v39 = vmax.f32 %v890_v5, 0.0 }
 0x816   : > { %v2060_v40 = vadd.f32 %v918_v39, %v1888_v27  ;;  %v919_v27 = vmax.f32 %v913_v14, 0.0 }
 0x818   : > { %1081 = vrot.lane.b32.xlu0 %v2060_v40, %s1493_s14  ;;  %964 = vrot.lane.b32.xlu2 %v2060_v40, %s1494_s15  ;;  %v2071_v50 = vadd.f32 %v919_v27, %v1891_v42  ;;  %v2105_v42 = vpop.permute.xlu2 %1022  ;;  %v1041_v27 = vmul.f32 %v1035_v61, %v2060_v40 }
 0x819   : > { %929 = vrot.lane.b32.xlu1 %v2060_v40, %s1495_s17  ;;  %v892_v48 = vpop.f32.mrf.mxu0  ;;  %v915_v28 = vpop.f32.mrf.mxu1 }
 0x81a   : > { %v893_v43 = vadd.f32 %v892_v48, %v864_v41  ;;  %v916_v4 = vadd.f32 %v915_v28, %v864_v41 }
 0x81c   : > { %v920_v44 = vmax.f32 %v893_v43, 0.0  ;;  %v921_v45 = vmax.f32 %v916_v4, 0.0 }
 0x81e   : > { %v924_v46 = vadd.f32 %v920_v44, %v1875_v36  ;;  %v925_v47 = vadd.f32 %v921_v45, %v1878_v38  ;;  %v1497_v36 = vmov 7   ;;  %v928_v38 = vld [vmem:[%s2277_s1 + $0x90] sm:$0x1]  ;;  %v1042_v44 = vmul.f32 %v1035_v61, %v2071_v50 }
 0x81f   : > { %1446 = vset.pattern.permute.xlu0 %v1497_v36 }
 0x820   : > { %v2073_v51 = vmul.f32 %v1039_v32, %v924_v46  ;;  %v2075_v52 = vmul.f32 %v1039_v32, %v925_v47  ;;  %1118 = vrot.lane.b32.xlu0 %v2060_v40, %s1496_s18  ;;  %1001 = vrot.lane.b32.xlu2 %v2060_v40, %s1484_s28  ;;  %v2108_v53 = vpop.permute.xlu2 %1070 }
 0x821   : > { %933 = vrot.lane.b32.xlu1 %v2071_v50, %s1495_s17 }
 0x828   : > { %966 = vrot.lane.b32.xlu0 %v924_v46, %s1494_s15  ;;  %1005 = vrot.lane.b32.xlu2 %v2071_v50, %s1484_s28  ;;  %v2112_v54 = vpop.permute.xlu2 %1107 }
 0x829   : > { %968 = vrot.lane.b32.xlu1 %v2071_v50, %s1494_s15 }
 0x830   : > { %1007 = vrot.lane.b32.xlu0 %v925_v47, %s1484_s28  ;;  %1049 = vrot.lane.b32.xlu2 %v2060_v40, %s1483_s27 }
 0x831   : > { %1003 = vrot.lane.b32.xlu1 %v924_v46, %s1484_s28 }
 0x838   : > { %1055 = vrot.lane.b32.xlu0 %v925_v47, %s1483_s27  ;;  %1053 = vrot.lane.b32.xlu2 %v2071_v50, %s1483_s27 }
 0x839   : > { %1051 = vrot.lane.b32.xlu1 %v924_v46, %s1483_s27  ;;  %s1252_s27 = sshll.u32 %s1243_s12, 1 }
 0x83a   : > { %p166_p8 = scmp.lt.s32.totalorder %s1252_s27, 7 }
 0x83c   : > { %s2287_s27 = smov (!%p166_p8, %s1252_s27), 7 }
 0x83d   : > { %s168_s21 = scalar_lea.vmem %s2278_s2, %s2287_s27 }
 0x840   : > { %1087 = vrot.lane.b32.xlu0 %v925_v47, %s1493_s14  ;;  %1085 = vrot.lane.b32.xlu2 %v2071_v50, %s1493_s14 }
 0x841   : > { %1083 = vrot.lane.b32.xlu1 %v924_v46, %s1493_s14 }
 0x848   : > { %1124 = vrot.lane.b32.xlu0 %v925_v47, %s1496_s18  ;;  %931 = vrot.lane.b32.xlu2 %v924_v46, %s1495_s17 }
 0x849   : > { %1120 = vrot.lane.b32.xlu1 %v924_v46, %s1496_s18 }
 0x850   : > { %935 = vrot.lane.b32.xlu2 %v925_v47, %s1495_s17  ;;  %1171 = vperm.xlu0 %1446, %v928_v38  }
 0x851   : > { %1140 = vperm.xlu1 %1444, %v1999_v17  }
 0x858   : > { %970 = vrot.lane.b32.xlu2 %v925_v47, %s1494_s15 }
 0x860   : > { %1122 = vrot.lane.b32.xlu2 %v2071_v50, %s1496_s18 }
 0x868   : > { %1144 = vperm.xlu2 %1445, %v1993_v10  }
 0x872   : > { %v965_v56 = vpop.permute.xlu2 %964 }
 0x87a   : > { %v1002_v59 = vpop.permute.xlu2 %1001 }
 0x882   : > { %v1006_v62 = vpop.permute.xlu2 %1005 }
 0x883   : > { %v1009_v17 = vsel %vm206_vm5, %v1002_v59, %v1006_v62  ;;  %v1011_v18 = vsel %vm206_vm5, %v1006_v62, %v1002_v59 }
 0x884   : > { %v1013_v26 = vsel %vm185_vm6, 1.0, %v1011_v18  ;;  %v1014_v29 = vsel %vm186_vm7, 1.0, %v1009_v17 }
 0x885   : > { %v1025_v39 = vmul.f32 %v2057_v37, %v1013_v26  ;;  %v1026_v14 = vmul.f32 %v2057_v37, %v1014_v29 }
 0x88a   : > { %v2116_v63 = vpop.permute.xlu0 %1081  ;;  %v1050_v0 = vpop.permute.xlu2 %1049 }
 0x88b   : > { %v930_v1 = vpop.permute.xlu1 %929 }
 0x892   : > { %v2118_v2 = vpop.permute.xlu0 %1118  ;;  %v1054_v3 = vpop.permute.xlu2 %1053 }
 0x893   : > { %v934_v7 = vpop.permute.xlu1 %933  ;;  %v1057_v30 = vsel %vm227_vm2, %v1050_v0, %v1054_v3  ;;  %v1059_v13 = vsel %vm227_vm2, %v1054_v3, %v1050_v0 }
 0x894   : > { %v938_v9 = vsel %vm937_vm10, %v930_v1, %v934_v7  ;;  %v940_v10 = vsel %vm937_vm10, %v934_v7, %v930_v1  ;;  %v1061_v43 = vsel %vm179_vm0, 0.0, %v1057_v30  ;;  %v1062_v4 = vsel %vm180_vm1, 0.0, %v1059_v13 }
 0x895   : > { %v946_v23 = vsel %vm189_vm11, 1.0, %v940_v10  ;;  %v947_v21 = vsel %vm190_vm12, 1.0, %v938_v9  ;;  %v1073_v38 = vmul.f32 %v1067_v57, %v1061_v43 }
 0x896   : > { %v960_v8 = vmul.f32 %v953_v55, %v946_v23  ;;  %v961_v34 = vmul.f32 %v953_v55, %v947_v21  ;;  %v1074_v55 = vmul.f32 %v1067_v57, %v1062_v4 }
 0x89a   : > { %v967_v20 = vpop.permute.xlu0 %966  ;;  %v2132_v12 = vpop.permute.xlu2 %1085 }
 0x89b   : > { %v969_v49 = vpop.permute.xlu1 %968  ;;  %v1090_v41 = vsel %vm1089_vm3, %v2116_v63, %v2132_v12 }
 0x89c   : > { %v973_v24 = vsel %vm972_vm13, %v965_v56, %v969_v49  ;;  %v975_v25 = vsel %vm972_vm13, %v969_v49, %v965_v56  ;;  %v1098_v47 = vsel %vm181_vm4, 0.0, %v1090_v41 }
 0x89d   : > { %v981_v31 = vsel %vm187_vm14, 1.0, %v975_v25  ;;  %v982_v6 = vsel %vm188_vm15, 1.0, %v973_v24  ;;  %v1110_v59 = vmul.f32 %v2114_v60, %v1098_v47 }
 0x89e   : > { %v993_v35 = vmul.f32 %v987_v58, %v981_v31  ;;  %v994_v5 = vmul.f32 %v987_v58, %v982_v6 }
 0x8a0   : > { %v997_v48 = vadd.f32 %v993_v35, %v960_v8  ;;  %v998_v28 = vadd.f32 %v994_v5, %v961_v34 }
 0x8a2   : > { %v1029_v45 = vadd.f32 %v1025_v39, %v997_v48  ;;  %v1030_v32 = vadd.f32 %v1026_v14, %v998_v28  ;;  %v1008_v37 = vpop.permute.xlu0 %1007  ;;  %v932_v46 = vpop.permute.xlu2 %931 }
 0x8a3   : > { %v1004_v36 = vpop.permute.xlu1 %1003 }
 0x8a4   : > { %v1045_v56 = vadd.f32 %v1041_v27, %v1029_v45  ;;  %v1046_v58 = vadd.f32 %v1042_v44, %v1030_v32  ;;  %v1010_v57 = vsel %vm206_vm5, %v1004_v36, %v1008_v37  ;;  %v1012_v9 = vsel %vm206_vm5, %v1008_v37, %v1004_v36 }
 0x8a5   : > { %v1015_v21 = vsel %vm185_vm6, 1.0, %v1012_v9  ;;  %v1016_v49 = vsel %vm186_vm7, 1.0, %v1010_v57  ;;  %vm182_vm5 = vcmp.ge.s32.totalorder %v1594_v22, 30  ;;  %vm1126_vm6 = vcmp.lt.s32.totalorder %v1586_v15, 125 }
 0x8a6   : > { %v1077_v62 = vadd.f32 %v1073_v38, %v1045_v56  ;;  %v2173_v0 = vadd.f32 %v1074_v55, %v1046_v58  ;;  %v1027_v34 = vmul.f32 %v2105_v42, %v1015_v21  ;;  %v1028_v35 = vmul.f32 %v2105_v42, %v1016_v49 }
 0x8a7   : > { %vm1184_vm7 = vcmp.lt.s32.totalorder %v174_v11, 256 }
 0x8a8   : > { %v2175_v40 = vadd.f32 %v1110_v59, %v1077_v62 }
 0x8aa   : > { %v1056_v50 = vpop.permute.xlu0 %1055  ;;  %v936_v61 = vpop.permute.xlu2 %935 }
 0x8ab   : > { %v1052_v1 = vpop.permute.xlu1 %1051  ;;  %v939_v3 = vsel %vm937_vm10, %v932_v46, %v936_v61  ;;  %v941_v7 = vsel %vm937_vm10, %v936_v61, %v932_v46 }
 0x8ac   : > { %v948_v10 = vsel %vm189_vm11, 1.0, %v941_v7  ;;  %v949_v17 = vsel %vm190_vm12, 1.0, %v939_v3  ;;  %v1060_v5 = vsel %vm227_vm2, %v1056_v50, %v1052_v1 }
 0x8ad   : > { %v962_v13 = vmul.f32 %v2053_v16, %v948_v10  ;;  %v963_v31 = vmul.f32 %v2053_v16, %v949_v17  ;;  %v1092_v16 = vsel %vm1089_vm3, %v2132_v12, %v2116_v63  ;;  %v1064_v48 = vsel %vm180_vm1, 0.0, %v1060_v5 }
 0x8ae   : > { %v1099_v44 = vsel %vm182_vm5, 0.0, %v1092_v16  ;;  %v1076_v37 = vmul.f32 %v2108_v53, %v1064_v48  ;;  %vm184_vm1 = vcmp.ge.s32.totalorder %v1594_v22, 29 }
 0x8af   : > { %v1111_v56 = vmul.f32 %v2114_v60, %v1099_v44 }
 0x8b2   : > { %v1088_v18 = vpop.permute.xlu0 %1087  ;;  %v971_v23 = vpop.permute.xlu2 %970 }
 0x8b3   : > { %v974_v26 = vsel %vm972_vm13, %v967_v20, %v971_v23  ;;  %v976_v29 = vsel %vm972_vm13, %v971_v23, %v967_v20  ;;  %v1084_v24 = vpop.permute.xlu1 %1083  ;;  %v1058_v20 = vsel %vm227_vm2, %v1052_v1, %v1056_v50  ;;  %vm1179_vm2 = vcmask 1040384  }
 0x8b4   : > { %v983_v25 = vsel %vm187_vm14, 1.0, %v976_v29  ;;  %v984_v30 = vsel %vm188_vm15, 1.0, %v974_v26  ;;  %v1063_v42 = vsel %vm179_vm0, 0.0, %v1058_v20  ;;  %v1091_v43 = vsel %vm1089_vm3, %v1084_v24, %v1088_v18 }
 0x8b5   : > { %v995_v6 = vmul.f32 %v2055_v33, %v983_v25  ;;  %v996_v8 = vmul.f32 %v2055_v33, %v984_v30  ;;  %v1093_v4 = vsel %vm1089_vm3, %v1088_v18, %v1084_v24  ;;  %v1075_v32 = vmul.f32 %v2108_v53, %v1063_v42 }
 0x8b6   : > { %vm183_vm0 = vcmp.ge.s32.totalorder %v1592_v19, 29  ;;  %v1100_v46 = vsel %vm181_vm4, 0.0, %v1091_v43 }
 0x8b7   : > { %v999_v39 = vadd.f32 %v995_v6, %v962_v13  ;;  %v1000_v14 = vadd.f32 %v996_v8, %v963_v31  ;;  %v1112_v58 = vmul.f32 %v2112_v54, %v1100_v46 }
 0x8b9   : > { %v1031_v33 = vadd.f32 %v1027_v34, %v999_v39  ;;  %v1032_v41 = vadd.f32 %v1028_v35, %v1000_v14 }
 0x8ba   : > { %v1123_v28 = vpop.permute.xlu2 %1122  ;;  %v1125_v45 = vpop.permute.xlu0 %1124 }
 0x8bb   : > { %v1121_v27 = vpop.permute.xlu1 %1120  ;;  %v1047_v63 = vadd.f32 %v2073_v51, %v1031_v33  ;;  %v1048_v12 = vadd.f32 %v2075_v52, %v1032_v41  ;;  %v1101_v51 = vsel %vm182_vm5, 0.0, %v1093_v4  ;;  %v1127_v52 = vsel %vm1126_vm6, %v2118_v2, %v1123_v28 }
 0x8bc   : > { %v1129_v47 = vsel %vm1126_vm6, %v1123_v28, %v2118_v2  ;;  %v1128_v53 = vsel %vm1126_vm6, %v1121_v27, %v1125_v45  ;;  %v1130_v36 = vsel %vm1126_vm6, %v1125_v45, %v1121_v27  ;;  %v1113_v59 = vmul.f32 %v2112_v54, %v1101_v51 }
 0x8bd   : > { %v1079_v38 = vadd.f32 %v1075_v32, %v1047_v63  ;;  %v1080_v55 = vadd.f32 %v1076_v37, %v1048_v12  ;;  %v1137_v50 = vsel %vm183_vm0, 0.0, %v1128_v53  ;;  %v1138_v2 = vsel %vm184_vm1, 0.0, %v1130_v36 }
 0x8be   : > { %v1135_v61 = vsel %vm183_vm0, 0.0, %v1127_v52  ;;  %v1136_v15 = vsel %vm184_vm1, 0.0, %v1129_v47  ;;  %v1115_v54 = vadd.f32 %v1111_v56, %v2173_v0 }
 0x8bf   : > { %v1116_v1 = vadd.f32 %v1112_v58, %v1079_v38  ;;  %v1117_v3 = vadd.f32 %v1113_v59, %v1080_v55 }
 0x8c2   : > { %v1145_v62 = vpop.permute.xlu2 %1144  ;;  %v1172_v8 = vpop.permute.xlu0 %1171 }
 0x8c3   : > { %v1149_v60 = vmul.f32 %v1145_v62, %v1137_v50  ;;  %v1150_v7 = vmul.f32 %v1145_v62, %v1138_v2  ;;  %v1141_v57 = vpop.permute.xlu1 %1140 }
 0x8c4   : > { %v1147_v9 = vmul.f32 %v1141_v57, %v1135_v61  ;;  %v1148_v10 = vmul.f32 %v1141_v57, %v1136_v15 }
 0x8c5   : > { %v1153_v17 = vadd.f32 %v1149_v60, %v1116_v1  ;;  %v1154_v18 = vadd.f32 %v1150_v7, %v1117_v3 }
 0x8c6   : > { %v1151_v23 = vadd.f32 %v1147_v9, %v2175_v40  ;;  %v1152_v21 = vadd.f32 %v1148_v10, %v1115_v54 }
 0x8c8   : > { %v1155_v19 = vadd.f32 %v1153_v17, %v1151_v23  ;;  %v1162_v49 = vadd.f32 %v1154_v18, %v1152_v21 }
 0x8ca   : > { %v1156_v26 = vrot.slane %v1155_v19, 4  ;;  %v1163_v22 = vrot.slane %v1162_v49, 4 }
 0x8cc   : > { %v1157_v29 = vadd.f32 %v1156_v26, %v1155_v19  ;;  %v1164_v24 = vadd.f32 %v1163_v22, %v1162_v49 }
 0x8ce   : > { %v1158_v25 = vrot.slane %v1157_v29, 2  ;;  %v1165_v30 = vrot.slane %v1164_v24, 2 }
 0x8d0   : > { %v1159_v13 = vadd.f32 %v1158_v25, %v1157_v29  ;;  %v1166_v0 = vadd.f32 %v1165_v30, %v1164_v24 }
 0x8d2   : > { %v1160_v31 = vrot.slane %v1159_v13, 1  ;;  %v1167_v6 = vrot.slane %v1166_v0, 1 }
 0x8d4   : > { %v1161_v34 = vadd.f32 %v1160_v31, %v1159_v13  ;;  %v1168_v40 = vadd.f32 %v1167_v6, %v1166_v0 }
 0x8d6   : > { %v1175_v35 = vadd.f32 %v1172_v8, %v1168_v40  ;;  %v1174_v20 = vadd.f32 %v1172_v8, %v1161_v34 }
 0x8d8   : > { %v1178_v5 = vrot.slane %v1175_v35, 7 }
 0x8da   : > { %v1180_v39 = vsel %vm1179_vm2, %v1174_v20, %v1178_v5 }
 0x8db   : > { %1186 = vst.msk [vmem:[%s168_s21] sm:$0x3] %vm1184_vm7, %v1180_v39 }
 0x8dc PF: > { %p9_p9 = scmp.ge.s32.totalorder %s1530_s13, 6   ;;  %s2283_s9 = smov %s1477_s10 }
 0x8dd   : > { %s2284_s10 = smov %s1539_s16  ;;  %s2285_s11 = smov %s1530_s13 }
 0x8de   :  { %11 = sbr.rel (!%p9_p9) target bundleno = 2 (0x2), region = 86 }

</bundles_post_ra>
